<compile_context>
chip_gen: v7x
topology: tpu7x:2x2x1
jax: 0.10.0
libtpu: 0.0.40
codegen_flags: <defaults>
</compile_context>

<pallas_src>
import functools
import math

import jax
import jax.numpy as jnp
import numpy as np
from jax.experimental import pallas as pl
from jax.experimental.pallas import tpu as pltpu

NUM_GROUPS = 16
EPS = 1e-5


def _gelu_exact(x):
    # nn.GELU() default = exact erf formulation (keep module semantics).
    return 0.5 * x * (1.0 + jax.lax.erf(x * (1.0 / math.sqrt(2.0))))


# ----------------------------- kernel -----------------------------
def _make_kernel(use_channel_up, lane_reduce, mxu_dtype):
    G = NUM_GROUPS

    def kernel(*refs):
        it = iter(refs)
        x_ref = next(it)
        mask_ref = next(it)
        if lane_reduce:
            samp = sampT = None
        else:
            samp_ref = next(it)
            sampT_ref = next(it)
        scat1_ref = next(it); gath1_ref = next(it); beta1_ref = next(it)
        wc1_ref = next(it); bc1_ref = next(it)
        scat2_ref = next(it); gath2_ref = next(it); beta2_ref = next(it)
        wc2_ref = next(it); bc2_ref = next(it)
        if use_channel_up:
            wup_ref = next(it); bup_ref = next(it)
        o_ref = next(it)

        x = x_ref[...]                       # (C_in, NL) f32, NL = bb * L_pad lanes
        not_first = mask_ref[0:1, :]         # (1, NL): 0 at sample-start lanes
        not_last = mask_ref[1:2, :]          # (1, NL): 0 at lanes whose conv 'next' is zero-pad
        nl = x.shape[1]
        if not lane_reduce:
            samp = samp_ref[...]             # (Bb, NL) sample indicator (broadcast)
            sampT = sampT_ref[...]           # (NL, Bb) indicator, 0 on padded lanes (stats)

        # GroupNorm: inv folded into scat, gamma folded into gath (host-side).
        # One-pass stats: [mean ; E[x^2]] from one stacked matmul chain; rsqrt
        # only at the tiny (G, Bb) stage, broadcast back via matmuls.
        def groupnorm(v, scat_ref, gath_ref, beta_ref):
            C = v.shape[0]
            stacked = jnp.concatenate([v, v * v], axis=0)                 # (2C, NL) f32
            gsum = jnp.dot(scat_ref[...], stacked,
                           preferred_element_type=jnp.float32)            # (2G, NL)
            if lane_reduce:
                s = jnp.sum(gsum, axis=1, keepdims=True)                  # (2G, 1)
            else:
                s = jnp.dot(gsum, sampT, preferred_element_type=jnp.float32)  # (2G, Bb)
            mean, ex2 = s[:G], s[G:]
            var = jnp.maximum(ex2 - mean * mean, 0.0)
            istd = jax.lax.rsqrt(var + EPS)                               # (G, Bb) only
            stats = jnp.concatenate([istd, mean * istd], axis=0)          # (2G, Bb)
            if lane_reduce:
                bc = jnp.dot(gath_ref[...], stats,
                             preferred_element_type=jnp.float32)          # (2C, 1)
            else:
                bc = jnp.dot(gath_ref[...],
                             jnp.dot(stats, samp, preferred_element_type=jnp.float32),
                             preferred_element_type=jnp.float32)          # (2C, NL)
            scale, shift = bc[:C], bc[C:]          # scale = gamma*istd, shift = gamma*mean*istd
            return v * scale + (beta_ref[...] - shift)

        # 3-tap 'same' conv: three accumulating (C_out, C) x (C, NL) dots
        # (no (3C, NL) taps buffer).  +-1 shifted operands via pltpu.roll +
        # per-sample boundary masks.
        def conv3(v, w_ref, b_ref):
            vb = v.astype(mxu_dtype)
            prev = (pltpu.roll(v, 1, 1) * not_first).astype(mxu_dtype)    # x[l-1]
            nxt = (pltpu.roll(v, nl - 1, 1) * not_last).astype(mxu_dtype) # x[l+1]
            out = jnp.dot(w_ref[0], prev, preferred_element_type=jnp.float32)
            out = out + jnp.dot(w_ref[1], vb, preferred_element_type=jnp.float32)
            out = out + jnp.dot(w_ref[2], nxt, preferred_element_type=jnp.float32)
            return out + b_ref[...]

        # ---- block(x) ----
        h = groupnorm(x, scat1_ref, gath1_ref, beta1_ref)
        h = _gelu_exact(h)
        h = conv3(h, wc1_ref, bc1_ref)
        h = groupnorm(h, scat2_ref, gath2_ref, beta2_ref)
        h = _gelu_exact(h)
        h = conv3(h, wc2_ref, bc2_ref)

        # ---- skip path ----
        if use_channel_up:
            skip = jnp.dot(wup_ref[...], x.astype(mxu_dtype),
                           preferred_element_type=jnp.float32) + bup_ref[...]
        else:
            skip = x

        o_ref[...] = (skip + h).astype(o_ref.dtype)

    return kernel


# ----------------------------- host-side maps -----------------------------
def _scat_map(C, inv):
    """(2G, 2C) block-diag scatter (group sum) with the 1/(cg*L) factor folded in."""
    G = NUM_GROUPS
    cg = C // G
    onehot = (np.arange(C)[None, :] // cg == np.arange(G)[:, None]).astype(np.float32)
    scat = np.zeros((2 * G, 2 * C), np.float32)
    scat[:G, :C] = onehot * inv
    scat[G:, C:] = onehot * inv
    return jnp.asarray(scat)


def _gath_map(C, gamma):
    """(2C, 2G) block-diag gather (group -> channel broadcast) with gamma folded in."""
    G = NUM_GROUPS
    cg = C // G
    onehotT = jnp.asarray(
        (np.arange(C)[:, None] // cg == np.arange(G)[None, :]).astype(np.float32))  # (C, G)
    blk = onehotT * gamma.reshape(C, 1).astype(jnp.float32)
    z = jnp.zeros((C, G), jnp.float32)
    top = jnp.concatenate([blk, z], axis=1)
    bot = jnp.concatenate([z, blk], axis=1)
    return jnp.concatenate([top, bot], axis=0)


# ----------------------------- tiling -----------------------------
def _vmem_capacity_bytes():
    try:
        return int(pltpu.get_tpu_info().vmem_capacity_bytes)
    except Exception:
        return 64 * 1024 * 1024  # conservative (v7x per-core VMEM)


def _choose_tiling(B, L, C_in, C_out, vmem_cap):
    """Returns (bb, L_pad): samples per grid step and padded per-sample length."""
    if L % 128 == 0 or (L < 128 and 128 % L == 0):
        L_pad = L
    else:
        # TODO(synk): halo L-tiling instead of per-sample padding for long ragged L.
        L_pad = ((L + 127) // 128) * 128

    if B * L_pad < 128:
        return B, L_pad                       # tiny problem: one full block, no padding waste

    c_max = max(C_in, C_out)
    # rough per-lane f32 footprint: double-buffered x/out blocks + live intermediates
    bytes_per_lane = 4 * (2 * C_in + 2 * C_out + 10 * c_max)
    budget = int(vmem_cap * 0.4)
    max_nl = max(128, (budget // bytes_per_lane) // 128 * 128)
    target_nl = min(2048, max_nl)

    if L_pad % 128 == 0:
        # bb <= ceil(B/2) keeps the grid >= 2 steps (megacore / pipelining).
        bb = max(1, min(target_nl // L_pad, (B + 1) // 2)) if B >= 2 else 1
    else:
        base = 128 // L_pad                    # samples needed for a 128-lane multiple
        k_batch = -(-B // base)
        k = max(1, min(target_nl // 128, k_batch // 2)) if k_batch >= 2 else 1
        bb = base * k
    return bb, L_pad


# ----------------------------- wrapper -----------------------------
@functools.partial(jax.jit, static_argnames=("mxu_dtype", "out_dtype"))
def residual_block(x, params, mxu_dtype=jnp.bfloat16, out_dtype=jnp.float32):
    """x: (B, C_in, L) float32; params: PyTorch-layout weights (see init_params)."""
    B, C_in, L = x.shape
    C_out = params["bc1"].shape[0]
    G = NUM_GROUPS
    assert C_in % G == 0 and C_out % G == 0, "GroupNorm(16, C) requires C % 16 == 0"
    use_channel_up = C_in != C_out

    vmem_cap = _vmem_capacity_bytes()
    bb, L_pad = _choose_tiling(B, L, C_in, C_out, vmem_cap)
    B_pad = -(-B // bb) * bb
    NL = bb * L_pad
    n_blocks = B_pad // bb
    lane_reduce = (bb == 1 and L_pad == L)

    # (B, C, L) -> (C, B_pad * L_pad): channels on sublanes, batch*length on lanes.
    xt = x
    if B_pad != B or L_pad != L:
        xt = jnp.pad(xt, ((0, B_pad - B), (0, 0), (0, L_pad - L)))
    xt = jnp.transpose(xt, (1, 0, 2)).reshape(C_in, B_pad * L_pad)

    # constant side inputs (grid-invariant blocks)
    lane = np.arange(NL)
    pos = lane % L_pad
    mask = np.stack([(pos != 0), (pos != L - 1)]).astype(np.float32)      # (2, NL)
    mask_j = jnp.asarray(mask)

    inv1 = 1.0 / float((C_in // G) * L)
    inv2 = 1.0 / float((C_out // G) * L)
    scat1 = _scat_map(C_in, inv1)
    gath1 = _gath_map(C_in, params["g1"])
    scat2 = _scat_map(C_out, inv2)
    gath2 = _gath_map(C_out, params["g2"])
    beta1 = params["b1"].reshape(C_in, 1).astype(jnp.float32)
    beta2 = params["b2"].reshape(C_out, 1).astype(jnp.float32)

    # conv weights as (3, C_out, C): one (C_out, C) slab per tap.
    wc1 = jnp.transpose(params["w1"], (2, 0, 1)).astype(mxu_dtype)
    wc2 = jnp.transpose(params["w2"], (2, 0, 1)).astype(mxu_dtype)
    bc1 = params["bc1"].reshape(C_out, 1).astype(jnp.float32)
    bc2 = params["bc2"].reshape(C_out, 1).astype(jnp.float32)

    def full(a):
        nd = a.ndim
        return pl.BlockSpec(a.shape, lambda i, _n=nd: (0,) * _n)

    inputs = [xt, mask_j]
    in_specs = [pl.BlockSpec((C_in, NL), lambda i: (0, i)), full(mask_j)]

    if not lane_reduce:
        samp = (lane[None, :] // L_pad == np.arange(bb)[:, None]).astype(np.float32)  # (bb, NL)
        valid = (pos < L).astype(np.float32)
        sampT = (samp * valid[None, :]).T                                             # (NL, bb)
        samp_j, sampT_j = jnp.asarray(samp), jnp.asarray(sampT)
        inputs += [samp_j, sampT_j]
        in_specs += [full(samp_j), full(sampT_j)]

    tail = [scat1, gath1, beta1, wc1, bc1, scat2, gath2, beta2, wc2, bc2]
    if use_channel_up:
        wup = params["wup"].reshape(C_out, C_in).astype(mxu_dtype)
        bup = params["bup"].reshape(C_out, 1).astype(jnp.float32)
        tail += [wup, bup]
    inputs += tail
    in_specs += [full(a) for a in tail]

    kernel = _make_kernel(use_channel_up, lane_reduce, mxu_dtype)
    vmem_limit = min(int(vmem_cap * 0.75), 96 * 1024 * 1024)

    out = pl.pallas_call(
        kernel,
        out_shape=jax.ShapeDtypeStruct((C_out, B_pad * L_pad), out_dtype),
        grid_spec=pltpu.PrefetchScalarGridSpec(
            num_scalar_prefetch=0,
            grid=(n_blocks,),
            in_specs=in_specs,
            out_specs=pl.BlockSpec((C_out, NL), lambda i: (0, i)),
        ),
        compiler_params=pltpu.CompilerParams(
            dimension_semantics=("parallel",),
            vmem_limit_bytes=vmem_limit,
        ),
    )(*inputs)

    # (C_out, B_pad*L_pad) -> (B, C_out, L)
    out = out.reshape(C_out, B_pad, L_pad)[:, :B, :L]
    return jnp.transpose(out, (1, 0, 2))


# ----------------------------- reference (pure JAX) -----------------------------
def _ref_groupnorm(x, gamma, beta):
    B, C, L = x.shape
    cg = C // NUM_GROUPS
    xg = x.reshape(B, NUM_GROUPS, cg * L)
    mean = xg.mean(axis=-1, keepdims=True)
    var = ((xg - mean) ** 2).mean(axis=-1, keepdims=True)
    xn = ((xg - mean) / jnp.sqrt(var + EPS)).reshape(B, C, L)
    return xn * gamma[None, :, None] + beta[None, :, None]


def _ref_conv3(x, w, b):
    B, C_in, L = x.shape
    xp = jnp.pad(x, ((0, 0), (0, 0), (1, 1)))
    out = 0.0
    for k in range(3):
        out = out + jnp.einsum("oi,bil->bol", w[:, :, k], xp[:, :, k:k + L])
    return out + b[None, :, None]


def _ref_forward(x, params):
    C_in = x.shape[1]
    C_out = params["bc1"].shape[0]
    h = _ref_groupnorm(x, params["g1"], params["b1"])
    h = _gelu_exact(h)
    h = _ref_conv3(h, params["w1"], params["bc1"])
    h = _ref_groupnorm(h, params["g2"], params["b2"])
    h = _gelu_exact(h)
    h = _ref_conv3(h, params["w2"], params["bc2"])
    if C_in != C_out:
        skip = jnp.einsum("oi,bil->bol", params["wup"], x) + params["bup"][None, :, None]
    else:
        skip = x
    return skip + h


# ----------------------------- parameter init -----------------------------
def init_params(key, C_in, C_out, k=3):
    keys = jax.random.split(key, 6)
    s1 = 1.0 / math.sqrt(C_in * k)
    s2 = 1.0 / math.sqrt(C_out * k)
    params = dict(
        g1=jnp.ones((C_in,), jnp.float32),   # GroupNorm affine defaults
        b1=jnp.zeros((C_in,), jnp.float32),
        g2=jnp.ones((C_out,), jnp.float32),
        b2=jnp.zeros((C_out,), jnp.float32),
        w1=jax.random.uniform(keys[0], (C_out, C_in, k), jnp.float32, -s1, s1),
        bc1=jax.random.uniform(keys[1], (C_out,), jnp.float32, -s1, s1),
        w2=jax.random.uniform(keys[2], (C_out, C_out, k), jnp.float32, -s2, s2),
        bc2=jax.random.uniform(keys[3], (C_out,), jnp.float32, -s2, s2),
    )
    if C_in != C_out:
        su = 1.0 / math.sqrt(C_in)
        params["wup"] = jax.random.uniform(keys[4], (C_out, C_in), jnp.float32, -su, su)
        params["bup"] = jax.random.uniform(keys[5], (C_out,), jnp.float32, -su, su)
    return params


if __name__ == "__main__":
    key = jax.random.PRNGKey(0)
    k1, k2, k3, k4, k5, k6, k7, k8 = jax.random.split(key, 8)

    # Case 1: in_channels != out_channels (channel_up 1x1 conv on the skip path).
    B, C_in, C_out, L = 2, 32, 64, 16
    x = jax.random.normal(k1, (B, C_in, L), jnp.float32)
    params = init_params(k2, C_in, C_out)
    y_ref = _ref_forward(x, params)

    y_f32 = jax.block_until_ready(residual_block(x, params, mxu_dtype=jnp.float32))
    assert y_f32.shape == (B, C_out, L)
    assert jnp.allclose(y_f32, y_ref, atol=2e-4, rtol=2e-4), "f32 path mismatch"

    y_bf16 = jax.block_until_ready(residual_block(x, params))   # default bf16 MXU operands
    assert jnp.allclose(y_bf16, y_ref, atol=1e-1, rtol=1e-1), "bf16 path mismatch"

    # Case 2: in_channels == out_channels (identity skip; wup/bup never passed/DMA'd).
    x2 = jax.random.normal(k3, (3, 32, 16), jnp.float32)
    params2 = init_params(k4, 32, 32)
    y2 = jax.block_until_ready(residual_block(x2, params2, mxu_dtype=jnp.float32))
    assert jnp.allclose(y2, _ref_forward(x2, params2), atol=2e-4, rtol=2e-4), \
        "identity-skip mismatch"

    # Case 3: ragged L (padded to 128 per sample), multi-block grid, channel_up path.
    x3 = jax.random.normal(k5, (4, 32, 100), jnp.float32)
    params3 = init_params(k6, 32, 64)
    y3 = jax.block_until_ready(residual_block(x3, params3, mxu_dtype=jnp.float32))
    assert jnp.allclose(y3, _ref_forward(x3, params3), atol=2e-4, rtol=2e-4), \
        "padded-L path mismatch"

    # Case 4: L % 128 == 0 with bb == 1 (lane-reduce stats path), 2-step grid.
    x4 = jax.random.normal(k7, (2, 64, 256), jnp.float32)
    params4 = init_params(k8, 64, 64)
    y4 = jax.block_until_ready(residual_block(x4, params4, mxu_dtype=jnp.float32))
    assert jnp.allclose(y4, _ref_forward(x4, params4), atol=2e-4, rtol=2e-4), \
        "lane-reduce path mismatch"

    print("KERNEL_OK")
</pallas_src>

<mosaic_0001>
module attributes {stable_mosaic.version = 11 : i64} {
  func.func @kernel(%arg0: i32, %arg1: memref<32x32xf32, #tpu.memory_space<vmem>>, %arg2: memref<2x32xf32, #tpu.memory_space<vmem>>, %arg3: memref<2x32xf32, #tpu.memory_space<vmem>>, %arg4: memref<32x2xf32, #tpu.memory_space<vmem>>, %arg5: memref<32x64xf32, #tpu.memory_space<vmem>>, %arg6: memref<64x32xf32, #tpu.memory_space<vmem>>, %arg7: memref<32x1xf32, #tpu.memory_space<vmem>>, %arg8: memref<3x64x32xf32, #tpu.memory_space<vmem>>, %arg9: memref<64x1xf32, #tpu.memory_space<vmem>>, %arg10: memref<32x128xf32, #tpu.memory_space<vmem>>, %arg11: memref<128x32xf32, #tpu.memory_space<vmem>>, %arg12: memref<64x1xf32, #tpu.memory_space<vmem>>, %arg13: memref<3x64x64xf32, #tpu.memory_space<vmem>>, %arg14: memref<64x1xf32, #tpu.memory_space<vmem>>, %arg15: memref<64x32xf32, #tpu.memory_space<vmem>>, %arg16: memref<64x1xf32, #tpu.memory_space<vmem>>, %arg17: memref<64x32xf32, #tpu.memory_space<vmem>>) attributes {dimension_semantics = [#tpu.dimension_semantics<parallel>], iteration_bounds = array<i64: 1>, scalar_prefetch = 0 : i64, scratch_operands = 0 : i64, tpu.core_type = #tpu.core_type<tc>, window_params = [{transform_indices = @transform_0, window_bounds = array<i64: 32, 32>}, {pipeline_mode = #tpu.pipeline_mode<synchronous>, transform_indices = @transform_1, window_bounds = array<i64: 2, 32>}, {pipeline_mode = #tpu.pipeline_mode<synchronous>, transform_indices = @transform_2, window_bounds = array<i64: 2, 32>}, {pipeline_mode = #tpu.pipeline_mode<synchronous>, transform_indices = @transform_3, window_bounds = array<i64: 32, 2>}, {pipeline_mode = #tpu.pipeline_mode<synchronous>, transform_indices = @transform_4, window_bounds = array<i64: 32, 64>}, {pipeline_mode = #tpu.pipeline_mode<synchronous>, transform_indices = @transform_5, window_bounds = array<i64: 64, 32>}, {pipeline_mode = #tpu.pipeline_mode<synchronous>, transform_indices = @transform_6, window_bounds = array<i64: 32, 1>}, {pipeline_mode = #tpu.pipeline_mode<synchronous>, transform_indices = @transform_7, window_bounds = array<i64: 3, 64, 32>}, {pipeline_mode = #tpu.pipeline_mode<synchronous>, transform_indices = @transform_8, window_bounds = array<i64: 64, 1>}, {pipeline_mode = #tpu.pipeline_mode<synchronous>, transform_indices = @transform_9, window_bounds = array<i64: 32, 128>}, {pipeline_mode = #tpu.pipeline_mode<synchronous>, transform_indices = @transform_10, window_bounds = array<i64: 128, 32>}, {pipeline_mode = #tpu.pipeline_mode<synchronous>, transform_indices = @transform_11, window_bounds = array<i64: 64, 1>}, {pipeline_mode = #tpu.pipeline_mode<synchronous>, transform_indices = @transform_12, window_bounds = array<i64: 3, 64, 64>}, {pipeline_mode = #tpu.pipeline_mode<synchronous>, transform_indices = @transform_13, window_bounds = array<i64: 64, 1>}, {pipeline_mode = #tpu.pipeline_mode<synchronous>, transform_indices = @transform_14, window_bounds = array<i64: 64, 32>}, {pipeline_mode = #tpu.pipeline_mode<synchronous>, transform_indices = @transform_15, window_bounds = array<i64: 64, 1>}, {transform_indices = @transform_16, window_bounds = array<i64: 64, 32>}]} {
    %c0 = arith.constant 0 : index
    %c0_0 = arith.constant 0 : index
    %0 = vector.load %arg1[%c0, %c0_0] : memref<32x32xf32, #tpu.memory_space<vmem>>, vector<32x32xf32>
    %c0_1 = arith.constant 0 : index
    %c0_2 = arith.constant 0 : index
    %1 = vector.load %arg2[%c0_1, %c0_2] : memref<2x32xf32, #tpu.memory_space<vmem>>, vector<1x32xf32>
    %c1 = arith.constant 1 : index
    %c0_3 = arith.constant 0 : index
    %2 = vector.load %arg2[%c1, %c0_3] : memref<2x32xf32, #tpu.memory_space<vmem>>, vector<1x32xf32>
    %c0_4 = arith.constant 0 : index
    %c0_5 = arith.constant 0 : index
    %3 = vector.load %arg3[%c0_4, %c0_5] : memref<2x32xf32, #tpu.memory_space<vmem>>, vector<2x32xf32>
    %c0_6 = arith.constant 0 : index
    %c0_7 = arith.constant 0 : index
    %4 = vector.load %arg4[%c0_6, %c0_7] : memref<32x2xf32, #tpu.memory_space<vmem>>, vector<32x2xf32>
    %5 = arith.mulf %0, %0 : vector<32x32xf32>
    %6 = tpu.concatenate %0, %5 in 0 : vector<32x32xf32>, vector<32x32xf32> -> vector<64x32xf32>
    %c0_8 = arith.constant 0 : index
    %c0_9 = arith.constant 0 : index
    %7 = vector.load %arg5[%c0_8, %c0_9] : memref<32x64xf32, #tpu.memory_space<vmem>>, vector<32x64xf32>
    %cst = arith.constant dense<0.000000e+00> : vector<32x32xf32>
    %8 = tpu.matmul %7, %6, %cst {dimension_numbers = #tpu.dot_dimension_numbers<[1], [0], [0], [1], [0, 0, 1, 1], [], []>} : vector<32x64xf32>, vector<64x32xf32>, vector<32x32xf32> -> vector<32x32xf32>
    %cst_10 = arith.constant dense<0.000000e+00> : vector<32x2xf32>
    %9 = tpu.matmul %8, %4, %cst_10 {dimension_numbers = #tpu.dot_dimension_numbers<[1], [0], [0], [1], [0, 0, 1, 1], [], []>} : vector<32x32xf32>, vector<32x2xf32>, vector<32x2xf32> -> vector<32x2xf32>
    %10 = vector.extract_strided_slice %9 {offsets = [0, 0], sizes = [16, 2], strides = [1, 1]} : vector<32x2xf32> to vector<16x2xf32>
    %11 = vector.extract_strided_slice %9 {offsets = [16, 0], sizes = [16, 2], strides = [1, 1]} : vector<32x2xf32> to vector<16x2xf32>
    %12 = arith.mulf %10, %10 : vector<16x2xf32>
    %13 = arith.subf %11, %12 : vector<16x2xf32>
    %cst_11 = arith.constant 0.000000e+00 : f32
    %14 = vector.broadcast %cst_11 : f32 to vector<16x2xf32>
    %15 = arith.maximumf %13, %14 : vector<16x2xf32>
    %cst_12 = arith.constant 9.99999974E-6 : f32
    %16 = vector.broadcast %cst_12 : f32 to vector<16x2xf32>
    %17 = arith.addf %15, %16 : vector<16x2xf32>
    %18 = math.rsqrt %17 : vector<16x2xf32>
    %19 = arith.mulf %10, %18 : vector<16x2xf32>
    %20 = tpu.concatenate %18, %19 in 0 : vector<16x2xf32>, vector<16x2xf32> -> vector<32x2xf32>
    %c0_13 = arith.constant 0 : index
    %c0_14 = arith.constant 0 : index
    %21 = vector.load %arg6[%c0_13, %c0_14] : memref<64x32xf32, #tpu.memory_space<vmem>>, vector<64x32xf32>
    %cst_15 = arith.constant dense<0.000000e+00> : vector<32x32xf32>
    %22 = tpu.matmul %20, %3, %cst_15 {dimension_numbers = #tpu.dot_dimension_numbers<[1], [0], [0], [1], [0, 0, 1, 1], [], []>} : vector<32x2xf32>, vector<2x32xf32>, vector<32x32xf32> -> vector<32x32xf32>
    %cst_16 = arith.constant dense<0.000000e+00> : vector<64x32xf32>
    %23 = tpu.matmul %21, %22, %cst_16 {dimension_numbers = #tpu.dot_dimension_numbers<[1], [0], [0], [1], [0, 0, 1, 1], [], []>} : vector<64x32xf32>, vector<32x32xf32>, vector<64x32xf32> -> vector<64x32xf32>
    %24 = vector.extract_strided_slice %23 {offsets = [0, 0], sizes = [32, 32], strides = [1, 1]} : vector<64x32xf32> to vector<32x32xf32>
    %25 = vector.extract_strided_slice %23 {offsets = [32, 0], sizes = [32, 32], strides = [1, 1]} : vector<64x32xf32> to vector<32x32xf32>
    %26 = arith.mulf %0, %24 : vector<32x32xf32>
    %c0_17 = arith.constant 0 : index
    %c0_18 = arith.constant 0 : index
    %27 = vector.load %arg7[%c0_17, %c0_18] : memref<32x1xf32, #tpu.memory_space<vmem>>, vector<32x1xf32>
    %28 = vector.broadcast %27 : vector<32x1xf32> to vector<32x32xf32>
    %29 = arith.subf %28, %25 : vector<32x32xf32>
    %30 = arith.addf %26, %29 : vector<32x32xf32>
    %cst_19 = arith.constant 5.000000e-01 : f32
    %31 = vector.broadcast %cst_19 : f32 to vector<32x32xf32>
    %32 = arith.mulf %31, %30 : vector<32x32xf32>
    %cst_20 = arith.constant 0.707106769 : f32
    %33 = vector.broadcast %cst_20 : f32 to vector<32x32xf32>
    %34 = arith.mulf %30, %33 : vector<32x32xf32>
    %35 = math.erf %34 : vector<32x32xf32>
    %cst_21 = arith.constant 1.000000e+00 : f32
    %36 = vector.broadcast %cst_21 : f32 to vector<32x32xf32>
    %37 = arith.addf %36, %35 : vector<32x32xf32>
    %38 = arith.mulf %32, %37 : vector<32x32xf32>
    %c1_i32 = arith.constant 1 : i32
    %39 = tpu.dynamic_rotate %38 by %c1_i32 dim 1 : vector<32x32xf32>, i32 -> vector<32x32xf32>
    %40 = vector.broadcast %1 : vector<1x32xf32> to vector<32x32xf32>
    %41 = arith.mulf %39, %40 : vector<32x32xf32>
    %c31_i32 = arith.constant 31 : i32
    %42 = tpu.dynamic_rotate %38 by %c31_i32 dim 1 : vector<32x32xf32>, i32 -> vector<32x32xf32>
    %43 = vector.broadcast %2 : vector<1x32xf32> to vector<32x32xf32>
    %44 = arith.mulf %42, %43 : vector<32x32xf32>
    %c0_22 = arith.constant 0 : index
    %c0_23 = arith.constant 0 : index
    %c0_24 = arith.constant 0 : index
    %45 = vector.load %arg8[%c0_22, %c0_23, %c0_24] : memref<3x64x32xf32, #tpu.memory_space<vmem>>, vector<1x64x32xf32>
    %46 = vector.shape_cast %45 : vector<1x64x32xf32> to vector<64x32xf32>
    %cst_25 = arith.constant dense<0.000000e+00> : vector<64x32xf32>
    %47 = tpu.matmul %46, %41, %cst_25 {dimension_numbers = #tpu.dot_dimension_numbers<[1], [0], [0], [1], [0, 0, 1, 1], [], []>} : vector<64x32xf32>, vector<32x32xf32>, vector<64x32xf32> -> vector<64x32xf32>
    %c1_26 = arith.constant 1 : index
    %c0_27 = arith.constant 0 : index
    %c0_28 = arith.constant 0 : index
    %48 = vector.load %arg8[%c1_26, %c0_27, %c0_28] : memref<3x64x32xf32, #tpu.memory_space<vmem>>, vector<1x64x32xf32>
    %49 = vector.shape_cast %48 : vector<1x64x32xf32> to vector<64x32xf32>
    %cst_29 = arith.constant dense<0.000000e+00> : vector<64x32xf32>
    %50 = tpu.matmul %49, %38, %cst_29 {dimension_numbers = #tpu.dot_dimension_numbers<[1], [0], [0], [1], [0, 0, 1, 1], [], []>} : vector<64x32xf32>, vector<32x32xf32>, vector<64x32xf32> -> vector<64x32xf32>
    %51 = arith.addf %47, %50 : vector<64x32xf32>
    %c2 = arith.constant 2 : index
    %c0_30 = arith.constant 0 : index
    %c0_31 = arith.constant 0 : index
    %52 = vector.load %arg8[%c2, %c0_30, %c0_31] : memref<3x64x32xf32, #tpu.memory_space<vmem>>, vector<1x64x32xf32>
    %53 = vector.shape_cast %52 : vector<1x64x32xf32> to vector<64x32xf32>
    %cst_32 = arith.constant dense<0.000000e+00> : vector<64x32xf32>
    %54 = tpu.matmul %53, %44, %cst_32 {dimension_numbers = #tpu.dot_dimension_numbers<[1], [0], [0], [1], [0, 0, 1, 1], [], []>} : vector<64x32xf32>, vector<32x32xf32>, vector<64x32xf32> -> vector<64x32xf32>
    %55 = arith.addf %51, %54 : vector<64x32xf32>
    %c0_33 = arith.constant 0 : index
    %c0_34 = arith.constant 0 : index
    %56 = vector.load %arg9[%c0_33, %c0_34] : memref<64x1xf32, #tpu.memory_space<vmem>>, vector<64x1xf32>
    %57 = vector.broadcast %56 : vector<64x1xf32> to vector<64x32xf32>
    %58 = arith.addf %55, %57 : vector<64x32xf32>
    %59 = arith.mulf %58, %58 : vector<64x32xf32>
    %60 = tpu.concatenate %58, %59 in 0 : vector<64x32xf32>, vector<64x32xf32> -> vector<128x32xf32>
    %c0_35 = arith.constant 0 : index
    %c0_36 = arith.constant 0 : index
    %61 = vector.load %arg10[%c0_35, %c0_36] : memref<32x128xf32, #tpu.memory_space<vmem>>, vector<32x128xf32>
    %cst_37 = arith.constant dense<0.000000e+00> : vector<32x32xf32>
    %62 = tpu.matmul %61, %60, %cst_37 {dimension_numbers = #tpu.dot_dimension_numbers<[1], [0], [0], [1], [0, 0, 1, 1], [], []>} : vector<32x128xf32>, vector<128x32xf32>, vector<32x32xf32> -> vector<32x32xf32>
    %cst_38 = arith.constant dense<0.000000e+00> : vector<32x2xf32>
    %63 = tpu.matmul %62, %4, %cst_38 {dimension_numbers = #tpu.dot_dimension_numbers<[1], [0], [0], [1], [0, 0, 1, 1], [], []>} : vector<32x32xf32>, vector<32x2xf32>, vector<32x2xf32> -> vector<32x2xf32>
    %64 = vector.extract_strided_slice %63 {offsets = [0, 0], sizes = [16, 2], strides = [1, 1]} : vector<32x2xf32> to vector<16x2xf32>
    %65 = vector.extract_strided_slice %63 {offsets = [16, 0], sizes = [16, 2], strides = [1, 1]} : vector<32x2xf32> to vector<16x2xf32>
    %66 = arith.mulf %64, %64 : vector<16x2xf32>
    %67 = arith.subf %65, %66 : vector<16x2xf32>
    %cst_39 = arith.constant 0.000000e+00 : f32
    %68 = vector.broadcast %cst_39 : f32 to vector<16x2xf32>
    %69 = arith.maximumf %67, %68 : vector<16x2xf32>
    %cst_40 = arith.constant 9.99999974E-6 : f32
    %70 = vector.broadcast %cst_40 : f32 to vector<16x2xf32>
    %71 = arith.addf %69, %70 : vector<16x2xf32>
    %72 = math.rsqrt %71 : vector<16x2xf32>
    %73 = arith.mulf %64, %72 : vector<16x2xf32>
    %74 = tpu.concatenate %72, %73 in 0 : vector<16x2xf32>, vector<16x2xf32> -> vector<32x2xf32>
    %c0_41 = arith.constant 0 : index
    %c0_42 = arith.constant 0 : index
    %75 = vector.load %arg11[%c0_41, %c0_42] : memref<128x32xf32, #tpu.memory_space<vmem>>, vector<128x32xf32>
    %cst_43 = arith.constant dense<0.000000e+00> : vector<32x32xf32>
    %76 = tpu.matmul %74, %3, %cst_43 {dimension_numbers = #tpu.dot_dimension_numbers<[1], [0], [0], [1], [0, 0, 1, 1], [], []>} : vector<32x2xf32>, vector<2x32xf32>, vector<32x32xf32> -> vector<32x32xf32>
    %cst_44 = arith.constant dense<0.000000e+00> : vector<128x32xf32>
    %77 = tpu.matmul %75, %76, %cst_44 {dimension_numbers = #tpu.dot_dimension_numbers<[1], [0], [0], [1], [0, 0, 1, 1], [], []>} : vector<128x32xf32>, vector<32x32xf32>, vector<128x32xf32> -> vector<128x32xf32>
    %78 = vector.extract_strided_slice %77 {offsets = [0, 0], sizes = [64, 32], strides = [1, 1]} : vector<128x32xf32> to vector<64x32xf32>
    %79 = vector.extract_strided_slice %77 {offsets = [64, 0], sizes = [64, 32], strides = [1, 1]} : vector<128x32xf32> to vector<64x32xf32>
    %80 = arith.mulf %58, %78 : vector<64x32xf32>
    %c0_45 = arith.constant 0 : index
    %c0_46 = arith.constant 0 : index
    %81 = vector.load %arg12[%c0_45, %c0_46] : memref<64x1xf32, #tpu.memory_space<vmem>>, vector<64x1xf32>
    %82 = vector.broadcast %81 : vector<64x1xf32> to vector<64x32xf32>
    %83 = arith.subf %82, %79 : vector<64x32xf32>
    %84 = arith.addf %80, %83 : vector<64x32xf32>
    %cst_47 = arith.constant 5.000000e-01 : f32
    %85 = vector.broadcast %cst_47 : f32 to vector<64x32xf32>
    %86 = arith.mulf %85, %84 : vector<64x32xf32>
    %cst_48 = arith.constant 0.707106769 : f32
    %87 = vector.broadcast %cst_48 : f32 to vector<64x32xf32>
    %88 = arith.mulf %84, %87 : vector<64x32xf32>
    %89 = math.erf %88 : vector<64x32xf32>
    %cst_49 = arith.constant 1.000000e+00 : f32
    %90 = vector.broadcast %cst_49 : f32 to vector<64x32xf32>
    %91 = arith.addf %90, %89 : vector<64x32xf32>
    %92 = arith.mulf %86, %91 : vector<64x32xf32>
    %c1_i32_50 = arith.constant 1 : i32
    %93 = tpu.dynamic_rotate %92 by %c1_i32_50 dim 1 : vector<64x32xf32>, i32 -> vector<64x32xf32>
    %94 = vector.broadcast %1 : vector<1x32xf32> to vector<64x32xf32>
    %95 = arith.mulf %93, %94 : vector<64x32xf32>
    %c31_i32_51 = arith.constant 31 : i32
    %96 = tpu.dynamic_rotate %92 by %c31_i32_51 dim 1 : vector<64x32xf32>, i32 -> vector<64x32xf32>
    %97 = vector.broadcast %2 : vector<1x32xf32> to vector<64x32xf32>
    %98 = arith.mulf %96, %97 : vector<64x32xf32>
    %c0_52 = arith.constant 0 : index
    %c0_53 = arith.constant 0 : index
    %c0_54 = arith.constant 0 : index
    %99 = vector.load %arg13[%c0_52, %c0_53, %c0_54] : memref<3x64x64xf32, #tpu.memory_space<vmem>>, vector<1x64x64xf32>
    %100 = vector.shape_cast %99 : vector<1x64x64xf32> to vector<64x64xf32>
    %cst_55 = arith.constant dense<0.000000e+00> : vector<64x32xf32>
    %101 = tpu.matmul %100, %95, %cst_55 {dimension_numbers = #tpu.dot_dimension_numbers<[1], [0], [0], [1], [0, 0, 1, 1], [], []>} : vector<64x64xf32>, vector<64x32xf32>, vector<64x32xf32> -> vector<64x32xf32>
    %c1_56 = arith.constant 1 : index
    %c0_57 = arith.constant 0 : index
    %c0_58 = arith.constant 0 : index
    %102 = vector.load %arg13[%c1_56, %c0_57, %c0_58] : memref<3x64x64xf32, #tpu.memory_space<vmem>>, vector<1x64x64xf32>
    %103 = vector.shape_cast %102 : vector<1x64x64xf32> to vector<64x64xf32>
    %cst_59 = arith.constant dense<0.000000e+00> : vector<64x32xf32>
    %104 = tpu.matmul %103, %92, %cst_59 {dimension_numbers = #tpu.dot_dimension_numbers<[1], [0], [0], [1], [0, 0, 1, 1], [], []>} : vector<64x64xf32>, vector<64x32xf32>, vector<64x32xf32> -> vector<64x32xf32>
    %105 = arith.addf %101, %104 : vector<64x32xf32>
    %c2_60 = arith.constant 2 : index
    %c0_61 = arith.constant 0 : index
    %c0_62 = arith.constant 0 : index
    %106 = vector.load %arg13[%c2_60, %c0_61, %c0_62] : memref<3x64x64xf32, #tpu.memory_space<vmem>>, vector<1x64x64xf32>
    %107 = vector.shape_cast %106 : vector<1x64x64xf32> to vector<64x64xf32>
    %cst_63 = arith.constant dense<0.000000e+00> : vector<64x32xf32>
    %108 = tpu.matmul %107, %98, %cst_63 {dimension_numbers = #tpu.dot_dimension_numbers<[1], [0], [0], [1], [0, 0, 1, 1], [], []>} : vector<64x64xf32>, vector<64x32xf32>, vector<64x32xf32> -> vector<64x32xf32>
    %109 = arith.addf %105, %108 : vector<64x32xf32>
    %c0_64 = arith.constant 0 : index
    %c0_65 = arith.constant 0 : index
    %110 = vector.load %arg14[%c0_64, %c0_65] : memref<64x1xf32, #tpu.memory_space<vmem>>, vector<64x1xf32>
    %111 = vector.broadcast %110 : vector<64x1xf32> to vector<64x32xf32>
    %112 = arith.addf %109, %111 : vector<64x32xf32>
    %c0_66 = arith.constant 0 : index
    %c0_67 = arith.constant 0 : index
    %113 = vector.load %arg15[%c0_66, %c0_67] : memref<64x32xf32, #tpu.memory_space<vmem>>, vector<64x32xf32>
    %cst_68 = arith.constant dense<0.000000e+00> : vector<64x32xf32>
    %114 = tpu.matmul %113, %0, %cst_68 {dimension_numbers = #tpu.dot_dimension_numbers<[1], [0], [0], [1], [0, 0, 1, 1], [], []>} : vector<64x32xf32>, vector<32x32xf32>, vector<64x32xf32> -> vector<64x32xf32>
    %c0_69 = arith.constant 0 : index
    %c0_70 = arith.constant 0 : index
    %115 = vector.load %arg16[%c0_69, %c0_70] : memref<64x1xf32, #tpu.memory_space<vmem>>, vector<64x1xf32>
    %116 = vector.broadcast %115 : vector<64x1xf32> to vector<64x32xf32>
    %117 = arith.addf %114, %116 : vector<64x32xf32>
    %118 = arith.addf %117, %112 : vector<64x32xf32>
    %c0_71 = arith.constant 0 : index
    %c0_72 = arith.constant 0 : index
    %119 = vector.load %arg17[%c0_71, %c0_72] : memref<64x32xf32, #tpu.memory_space<vmem>>, vector<64x32xf32>
    tpu.vector_store %arg17[%c0_71, %c0_72], %118 {strides = array<i32>} : memref<64x32xf32, #tpu.memory_space<vmem>>, vector<64x32xf32>,
    return
  }
  func.func @transform_0(%arg0: i32) -> (i32, i32) {
    %c0_i32 = arith.constant 0 : i32
    %c0_i32_0 = arith.constant 0 : i32
    return %c0_i32, %arg0 : i32, i32
  }
  func.func @transform_1(%arg0: i32) -> (i32, i32) {
    %c0_i32 = arith.constant 0 : i32
    %c0_i32_0 = arith.constant 0 : i32
    %c0_i32_1 = arith.constant 0 : i32
    return %c0_i32, %c0_i32_0 : i32, i32
  }
  func.func @transform_2(%arg0: i32) -> (i32, i32) {
    %c0_i32 = arith.constant 0 : i32
    %c0_i32_0 = arith.constant 0 : i32
    %c0_i32_1 = arith.constant 0 : i32
    return %c0_i32, %c0_i32_0 : i32, i32
  }
  func.func @transform_3(%arg0: i32) -> (i32, i32) {
    %c0_i32 = arith.constant 0 : i32
    %c0_i32_0 = arith.constant 0 : i32
    %c0_i32_1 = arith.constant 0 : i32
    return %c0_i32, %c0_i32_0 : i32, i32
  }
  func.func @transform_4(%arg0: i32) -> (i32, i32) {
    %c0_i32 = arith.constant 0 : i32
    %c0_i32_0 = arith.constant 0 : i32
    %c0_i32_1 = arith.constant 0 : i32
    return %c0_i32, %c0_i32_0 : i32, i32
  }
  func.func @transform_5(%arg0: i32) -> (i32, i32) {
    %c0_i32 = arith.constant 0 : i32
    %c0_i32_0 = arith.constant 0 : i32
    %c0_i32_1 = arith.constant 0 : i32
    return %c0_i32, %c0_i32_0 : i32, i32
  }
  func.func @transform_6(%arg0: i32) -> (i32, i32) {
    %c0_i32 = arith.constant 0 : i32
    %c0_i32_0 = arith.constant 0 : i32
    %c0_i32_1 = arith.constant 0 : i32
    return %c0_i32, %c0_i32_0 : i32, i32
  }
  func.func @transform_7(%arg0: i32) -> (i32, i32, i32) {
    %c0_i32 = arith.constant 0 : i32
    %c0_i32_0 = arith.constant 0 : i32
    %c0_i32_1 = arith.constant 0 : i32
    %c0_i32_2 = arith.constant 0 : i32
    return %c0_i32, %c0_i32_0, %c0_i32_1 : i32, i32, i32
  }
  func.func @transform_8(%arg0: i32) -> (i32, i32) {
    %c0_i32 = arith.constant 0 : i32
    %c0_i32_0 = arith.constant 0 : i32
    %c0_i32_1 = arith.constant 0 : i32
    return %c0_i32, %c0_i32_0 : i32, i32
  }
  func.func @transform_9(%arg0: i32) -> (i32, i32) {
    %c0_i32 = arith.constant 0 : i32
    %c0_i32_0 = arith.constant 0 : i32
    %c0_i32_1 = arith.constant 0 : i32
    return %c0_i32, %c0_i32_0 : i32, i32
  }
  func.func @transform_10(%arg0: i32) -> (i32, i32) {
    %c0_i32 = arith.constant 0 : i32
    %c0_i32_0 = arith.constant 0 : i32
    %c0_i32_1 = arith.constant 0 : i32
    return %c0_i32, %c0_i32_0 : i32, i32
  }
  func.func @transform_11(%arg0: i32) -> (i32, i32) {
    %c0_i32 = arith.constant 0 : i32
    %c0_i32_0 = arith.constant 0 : i32
    %c0_i32_1 = arith.constant 0 : i32
    return %c0_i32, %c0_i32_0 : i32, i32
  }
  func.func @transform_12(%arg0: i32) -> (i32, i32, i32) {
    %c0_i32 = arith.constant 0 : i32
    %c0_i32_0 = arith.constant 0 : i32
    %c0_i32_1 = arith.constant 0 : i32
    %c0_i32_2 = arith.constant 0 : i32
    return %c0_i32, %c0_i32_0, %c0_i32_1 : i32, i32, i32
  }
  func.func @transform_13(%arg0: i32) -> (i32, i32) {
    %c0_i32 = arith.constant 0 : i32
    %c0_i32_0 = arith.constant 0 : i32
    %c0_i32_1 = arith.constant 0 : i32
    return %c0_i32, %c0_i32_0 : i32, i32
  }
  func.func @transform_14(%arg0: i32) -> (i32, i32) {
    %c0_i32 = arith.constant 0 : i32
    %c0_i32_0 = arith.constant 0 : i32
    %c0_i32_1 = arith.constant 0 : i32
    return %c0_i32, %c0_i32_0 : i32, i32
  }
  func.func @transform_15(%arg0: i32) -> (i32, i32) {
    %c0_i32 = arith.constant 0 : i32
    %c0_i32_0 = arith.constant 0 : i32
    %c0_i32_1 = arith.constant 0 : i32
    return %c0_i32, %c0_i32_0 : i32, i32
  }
  func.func @transform_16(%arg0: i32) -> (i32, i32) {
    %c0_i32 = arith.constant 0 : i32
    %c0_i32_0 = arith.constant 0 : i32
    return %c0_i32, %arg0 : i32, i32
  }
}

</mosaic_0001>

<bundles_post_ra>
// kernel: residual_block.1
= control target key start
LH: loop header
LB: loop body
LE: loop exit
PB: predicated region body
PF: predicated region fallthrough
CT: control target
= control target key end

     0   :  { %vm72_vm0 = vcmask 523264   ;;  %vm170_vm1 = vcmask 261120   ;;  %vm301_vm2 = vcmask 1041408   ;;  %vm288_vm3 = vcmask 15360   ;;  %s3527_s22 = smov 31   ;;  %s3529_s24 = smov 97   ;;  %s4395_s0 = inlined_call_operand.vmem [shape: f32[32,32], index: 0, kind: input, shape index: {}]   ;;  %s4396_s4 = inlined_call_operand.vmem [shape: f32[32,64], index: 4, kind: input, shape index: {}]   ;;  %s4397_s3 = inlined_call_operand.vmem [shape: f32[32,2], index: 3, kind: input, shape index: {}]   ;;  %s4398_s2 = inlined_call_operand.vmem [shape: f32[2,32], index: 2, kind: input, shape index: {}]   ;;  %s4399_s5 = inlined_call_operand.vmem [shape: f32[64,32], index: 5, kind: input, shape index: {}]   ;;  %s4400_s6 = inlined_call_operand.vmem [shape: f32[32,1], index: 6, kind: input, shape index: {}]   ;;  %s4401_s1 = inlined_call_operand.vmem [shape: f32[2,32], index: 1, kind: input, shape index: {}]   ;;  %s4402_s7 = inlined_call_operand.vmem [shape: f32[3,64,32], index: 7, kind: input, shape index: {}]   ;;  %s4403_s8 = inlined_call_operand.vmem [shape: f32[64,1], index: 8, kind: input, shape index: {}]   ;;  %s4404_s11 = inlined_call_operand.vmem [shape: f32[64,1], index: 11, kind: input, shape index: {}]   ;;  %s4405_s9 = inlined_call_operand.vmem [shape: f32[32,128], index: 9, kind: input, shape index: {}]   ;;  %s4406_s10 = inlined_call_operand.vmem [shape: f32[128,32], index: 10, kind: input, shape index: {}]   ;;  %s4407_s12 = inlined_call_operand.vmem [shape: f32[3,64,64], index: 12, kind: input, shape index: {}]   ;;  %s4408_s13 = inlined_call_operand.vmem [shape: f32[64,1], index: 13, kind: input, shape index: {}]   ;;  %s4409_s15 = inlined_call_operand.vmem [shape: f32[64,1], index: 15, kind: input, shape index: {}]   ;;  %s4410_s14 = inlined_call_operand.vmem [shape: f32[64,32], index: 14, kind: input, shape index: {}]   ;;  %s4411_s16 = inlined_call_operand.vmem [shape: f32[64,32], index: 16, kind: output, shape index: {}]  }
   0x1   :  { %4413 = sst [smem:[#allocation2_spill]] %s4395_s0  ;;  %v68_v7 = vld [vmem:[%s4396_s4] sm:$0xff]  ;;  %v61_v10 = vld [vmem:[%s4397_s3 + $0x8] sm:$0xff]  ;;  %v62_v11 = vld [vmem:[%s4397_s3 + $0x10] sm:$0xff]  ;;  %v3525_v44 = vmov 0   ;;  %vm575_vm4 = vcmask 1047808  }
   0x2   :  { %s4414_s23 = sld [smem:[#allocation2_spill]]  ;;  %2905 = vmatprep.mubr.msk.f32.mxu0 %vm72_vm0, %v68_v7  ;;  %v60_v9 = vld [vmem:[%s4397_s3] sm:$0xff]  ;;  %v63_v12 = vld [vmem:[%s4397_s3 + $0x18] sm:$0xff]  ;;  %v69_v19 = vld [vmem:[%s4396_s4 + $0x8] sm:$0xff]  ;;  %3431 = vset.pattern.permute.xlu0 %v3525_v44  ;;  %s3528_s3 = smov 1  }
   0x3   :  { %v3666_v13 = vpack.c.bf16 %v61_v10, %v60_v9  ;;  %v3668_v14 = vpack.c.bf16 %v63_v12, %v62_v11  ;;  %v70_v20 = vld [vmem:[%s4396_s4 + $0x10] sm:$0xff]  ;;  %v71_v21 = vld [vmem:[%s4396_s4 + $0x18] sm:$0xff]  ;;  %v3699_v26 = vld [vmem:[%s4398_s2] sm:$0x3]  ;;  %3432 = vset.pattern.permute.xlu1 %v3525_v44 }
   0x4   :  { %v280_v43 = vld [vmem:[%s4399_s5] sm:$0xff]  ;;  %v525_v46 = vld [vmem:[%s4400_s6 + $0x10] sm:$0xff]  ;;  %v524_v47 = vld [vmem:[%s4400_s6 + $0x8] sm:$0xff] }
   0x5   :  { %3226 = vmatprep.subr.bf16.mxu1 %v3666_v13  ;;  %v523_v45 = vld [vmem:[%s4400_s6] sm:$0xff]  ;;  %539 = vperm.xlu1 %3432, %v525_v46   ;;  %v526_v48 = vld [vmem:[%s4400_s6 + $0x18] sm:$0xff]  ;;  %v281_v55 = vld [vmem:[%s4399_s5 + $0x8] sm:$0xff] }
   0x6   :  { %3228 = vmatpush3.bf16.msra.mxu1 %v3666_v13  ;;  %529 = vperm.xlu0 %3431, %v523_v45   ;;  %v282_v56 = vld [vmem:[%s4399_s5 + $0x10] sm:$0xff]  ;;  %v283_v57 = vld [vmem:[%s4399_s5 + $0x18] sm:$0xff]  ;;  %v284_v58 = vld [vmem:[%s4399_s5 + $0x20] sm:$0xff] }
   0x7   :  { %3230 = vmatprep.subr.bf16.mxu1 %v3668_v14  ;;  %v285_v59 = vld [vmem:[%s4399_s5 + $0x28] sm:$0xff]  ;;  %v286_v60 = vld [vmem:[%s4399_s5 + $0x30] sm:$0xff]  ;;  %v287_v61 = vld [vmem:[%s4399_s5 + $0x38] sm:$0xff]  ;;  %s3526_s5 = smov 32  }
   0x8   :  { %v3619_v0 = vld [vmem:[%s4414_s23] sm:$0xff]  ;;  %v3624_v1 = vld [vmem:[%s4414_s23 + $0x8] sm:$0xff]  ;;  %v3629_v2 = vld [vmem:[%s4414_s23 + $0x10] sm:$0xff] }
   0x9   :  { %v3633_v3 = vpack.c.bf16 %v3624_v1, %v3619_v0  ;;  %v3638_v4 = vld [vmem:[%s4414_s23 + $0x18] sm:$0xff]  ;;  %v64_v5 = vmul.f32 %v3619_v0, %v3619_v0  ;;  %v65_v6 = vmul.f32 %v3624_v1, %v3624_v1  ;;  %v66_v16 = vmul.f32 %v3629_v2, %v3629_v2  ;;  %544 = vperm.xlu1 %3432, %v526_v48  }
   0xa   :  { %v3649_v8 = vpack.c.bf16 %v3638_v4, %v3629_v2  ;;  %v67_v17 = vmul.f32 %v3638_v4, %v3638_v4  ;;  %3232 = vmatpush3.bf16.msra.mxu1 %v3668_v14  ;;  %534 = vperm.xlu0 %3431, %v524_v47   ;;  %v2588_v47 = vld [vmem:[%s4401_s1] ss:$0 sm:$0xff] }
   0xb   :  { %3210 = vmatprep.subr.bf16.mxu0 %v3633_v3  ;;  %v3217_v15 = vpack.c.bf16 %v65_v6, %v64_v5  ;;  %2925 = vmatprep.subr.msk.mxu1 %vm301_vm2, %v3699_v26 }
   0xc   :  { %3212 = vmatpush3.bf16.msra.mxu0 %v3633_v3  ;;  %v3221_v18 = vpack.c.bf16 %v67_v17, %v66_v16 }
   0xd   :  { %3214 = vmatprep.subr.bf16.mxu0 %v3649_v8 }
  0x10   :  { %3216 = vmatpush3.bf16.msra.mxu0 %v3649_v8 }
  0x11   :  { %3218 = vmatprep.subr.bf16.mxu0 %v3217_v15 }
  0x14   :  { %3220 = vmatpush3.bf16.msra.mxu0 %v3217_v15 }
  0x15   :  { %3222 = vmatprep.subr.bf16.mxu0 %v3221_v18 }
  0x18   :  { %3224 = vmatpush3.bf16.msra.mxu0 %v3221_v18 }
  0x1b   :  { %2906 = vmatmul.mubr.msk.f32.vlgmr.msra.gmra.mrb[0].mxu0 %vm72_vm0, %v69_v19 }
  0x1c   :  { %2908 = vmatprep.mubr.msk.f32.mxu0 %vm72_vm0, %v70_v20 }
  0x1f   :  { %2909 = vmatmul.mubr.msk.f32.gmra.mrb[2].mxu0 %vm72_vm0, %v71_v21 }
  0x20   :  { %2941 = vmatprep.mubr.msk.f32.mxu0 %vm170_vm1, %v280_v43 }
  0x84   :  { %v540_v9 = vpop.permute.xlu1 %539 }
  0x85   :  { %v530_v5 = vpop.permute.xlu0 %529 }
  0x88   :  { %v545_v19 = vpop.permute.xlu1 %544 }
  0x89   :  { %v535_v10 = vpop.permute.xlu0 %534 }
  0xee   :  { %v2907_v22 = vpop.f32.mrb[0].mxu0 }
  0xef   :  { %v151_v23 = vpop.f32.mrb[1].mxu0 }
  0xf0   :  { %2919 = vmatprep.mubr.msk.f32.mxu1 %vm170_vm1, %v151_v23 }
  0xf1   :  { %2920 = vmatmul.mubr.msk.f32.vlgmr.msra.gmra.mrb[0].mxu1 %vm170_vm1, %v2907_v22 }
  0xf2   :  { %v2910_v24 = vpop.f32.mrb[2].mxu0  ;;  %2926 = vmatpush3.msk.msra.mxu1 %vm301_vm2, %v3699_v26 }
  0xf3   :  { %v161_v25 = vpop.f32.mrb[3].mxu0 }
  0xf4   :  { %2922 = vmatprep.mubr.msk.f32.mxu1 %vm170_vm1, %v161_v25 }
  0xf5   :  { %2923 = vmatmul.mubr.msk.f32.gmra.mrb[2].mxu1 %vm170_vm1, %v2910_v24 }
 0x1c4   :  { %v2921_v27 = vpop.f32.mrb[0].mxu1 }
 0x1c5   :  { %v249_v28 = vpop.f32.mrb[1].mxu1  ;;  %v269_v29 = vmul.f32 %v2921_v27, %v2921_v27 }
 0x1c6   :  { %v268_v30 = vmul.f32 %v249_v28, %v249_v28 }
 0x1c8   :  { %v2924_v31 = vpop.f32.mrb[2].mxu1 }
 0x1c9   :  { %v271_v32 = vsub.f32 %v2924_v31, %v269_v29  ;;  %v259_v33 = vpop.f32.mrb[3].mxu1 }
 0x1ca   :  { %v270_v34 = vsub.f32 %v259_v33, %v268_v30 }
 0x1cb   :  { %v273_v35 = vmax.f32 %v271_v32, 0.0 }
 0x1cc   :  { %v272_v36 = vmax.f32 %v270_v34, 0.0 }
 0x1cd   :  { %v275_v37 = vadd.f32 1e-05, %v273_v35 }
 0x1ce   :  { %v274_v38 = vadd.f32 1e-05, %v272_v36 }
 0x1cf   :  { %3493 = vrsqrt.f32 %v275_v37 }
 0x1d0   :  { %3495 = vrsqrt.f32 %v274_v38 }
 0x1d9   :  { %v3494_v39 = vpop.eup %3493 }
 0x1da   :  { %v3496_v40 = vpop.eup %3495  ;;  %v279_v41 = vmul.f32 %v3494_v39, %v2921_v27 }
 0x1db   :  { %2927 = vmatprep.mubr.msk.f32.mxu1 %vm288_vm3, %v3496_v40  ;;  %v278_v42 = vmul.f32 %v3496_v40, %v249_v28 }
 0x1dc   :  { %2928 = vmatmul.mubr.msk.f32.vlgmr.msra.gmra.mrb[4].mxu1 %vm288_vm3, %v3494_v39 }
 0x1dd   :  { %2930 = vmatprep.mubr.msk.f32.mxu1 %vm288_vm3, %v278_v42 }
 0x1e0   :  { %2931 = vmatmul.mubr.msk.f32.gmra.mrb[6].mxu1 %vm288_vm3, %v279_v41 }
 0x2af   :  { %v2929_v49 = vpop.f32.mrb[4].mxu1 }
 0x2b0   :  { %v371_v50 = vpop.f32.mrb[5].mxu1 }
 0x2b1   :  { %v3233_v51 = vpack.c.bf16 %v2929_v49, %v371_v50 }
 0x2b3   :  { %v2932_v52 = vpop.f32.mrb[6].mxu1  ;;  %3234 = vmatprep.subr.bf16.mxu0 %v3233_v51 }
 0x2b4   :  { %v381_v53 = vpop.f32.mrb[7].mxu1  ;;  %3236 = vmatpush3.bf16.msra.mxu0 %v3233_v51 }
 0x2b5   :  { %v3237_v54 = vpack.c.bf16 %v2932_v52, %v381_v53 }
 0x2b7   :  { %3238 = vmatprep.subr.bf16.mxu0 %v3237_v54 }
 0x2b8   :  { %3240 = vmatpush3.bf16.msra.mxu0 %v3237_v54 }
 0x2b9   :  { %3298 = vmatprep.subr.bf16.mxu0 %v3666_v13 }
 0x2bb   :  { %2942 = vmatmul.mubr.msk.f32.vlgmr.msra.gmra.mrb[4].mxu0 %vm170_vm1, %v281_v55 }
 0x2bc   :  { %2944 = vmatprep.mubr.msk.f32.mxu0 %vm170_vm1, %v282_v56  ;;  %3300 = vmatpush3.bf16.msra.mxu0 %v3666_v13  ;;  %v2589_v56 = vld [vmem:[%s4401_s1 + $0x1] ss:$0 sm:$0xff] }
 0x2bd   :  { %3302 = vmatprep.subr.bf16.mxu0 %v3668_v14 }
 0x2bf   :  { %2945 = vmatmul.mubr.msk.f32.gmra.mrb[6].mxu0 %vm170_vm1, %v283_v57  ;;  %v2590_v57 = vld [vmem:[%s4402_s7 + $0x40] sm:$0xff] }
 0x2c0   :  { %2947 = vmatprep.mubr.msk.f32.mxu0 %vm170_vm1, %v284_v58  ;;  %3304 = vmatpush3.bf16.msra.mxu0 %v3668_v14  ;;  %v2591_v58 = vld [vmem:[%s4402_s7 + $0x48] sm:$0xff] }
 0x2c1   :  { %3065 = vmatprep.subr.msk.mxu0 %vm301_vm2, %v3699_v26  ;;  %2961 = vmatprep.mubr.msk.f32.mxu1 %vm170_vm1, %v2590_v57 }
 0x2c3   :  { %2948 = vmatmul.mubr.msk.f32.gmra.mrb[8].mxu0 %vm170_vm1, %v285_v59  ;;  %v2592_v59 = vld [vmem:[%s4402_s7 + $0x50] sm:$0xff] }
 0x2c4   :  { %2950 = vmatprep.mubr.msk.f32.mxu0 %vm170_vm1, %v286_v60  ;;  %v2593_v60 = vld [vmem:[%s4402_s7 + $0x58] sm:$0xff] }
 0x2c7   :  { %2951 = vmatmul.mubr.msk.f32.gmra.mrb[10].mxu0 %vm170_vm1, %v287_v61 }
 0x38e   :  { %v2943_v62 = vpop.f32.mrb[4].mxu0 }
 0x38f   :  { %v480_v63 = vpop.f32.mrb[5].mxu0  ;;  %v520_v12 = vmul.f32 %v2943_v62, %v3624_v1  ;;  %v2594_v62 = vld [vmem:[%s4402_s7 + $0x60] sm:$0xff] }
 0x390   :  { %v519_v15 = vmul.f32 %v480_v63, %v3619_v0  ;;  %v2595_v63 = vld [vmem:[%s4402_s7 + $0x68] sm:$0xff] }
 0x392   :  { %v2946_v6 = vpop.f32.mrb[6].mxu0 }
 0x393   :  { %v490_v7 = vpop.f32.mrb[7].mxu0  ;;  %v522_v21 = vmul.f32 %v2946_v6, %v3638_v4  ;;  %v2596_v6 = vld [vmem:[%s4402_s7 + $0x70] sm:$0xff] }
 0x394   :  { %v521_v25 = vmul.f32 %v490_v7, %v3629_v2 }
 0x396   :  { %v2949_v11 = vpop.f32.mrb[8].mxu0 }
 0x397   :  { %v548_v13 = vsub.f32 %v535_v10, %v2949_v11  ;;  %v500_v14 = vpop.f32.mrb[9].mxu0  ;;  %v2597_v10 = vld [vmem:[%s4402_s7 + $0x78] sm:$0xff] }
 0x398   :  { %v547_v16 = vsub.f32 %v530_v5, %v500_v14  ;;  %v624_v14 = vld [vmem:[%s4402_s7] sm:$0xff] }
 0x399   :  { %v552_v17 = vadd.f32 %v548_v13, %v520_v12 }
 0x39a   :  { %v551_v18 = vadd.f32 %v547_v16, %v519_v15  ;;  %v2952_v20 = vpop.f32.mrb[10].mxu0 }
 0x39b   :  { %v560_v22 = vmul.f32 0.70710677, %v552_v17  ;;  %v550_v23 = vsub.f32 %v545_v19, %v2952_v20  ;;  %v510_v24 = vpop.f32.mrb[11].mxu0  ;;  %v556_v33 = vmul.f32 0.5, %v552_v17 }
 0x39c   :  { %v559_v27 = vmul.f32 0.70710677, %v551_v18  ;;  %v549_v28 = vsub.f32 %v540_v9, %v510_v24  ;;  %v555_v4 = vmul.f32 0.5, %v551_v18 }
 0x39d   :  { %3497 = verf.f32 %v560_v22  ;;  %v554_v1 = vadd.f32 %v550_v23, %v522_v21 }
 0x39e   :  { %3499 = verf.f32 %v559_v27  ;;  %v553_v29 = vadd.f32 %v549_v28, %v521_v25 }
 0x39f   :  { %v562_v30 = vmul.f32 0.70710677, %v554_v1  ;;  %v558_v39 = vmul.f32 0.5, %v554_v1 }
 0x3a0   :  { %v561_v0 = vmul.f32 0.70710677, %v553_v29  ;;  %v557_v41 = vmul.f32 0.5, %v553_v29 }
 0x3a1   :  { %3501 = verf.f32 %v562_v30  ;;  %v1077_v30 = vld [vmem:[%s4403_s8] sm:$0xff] }
 0x3a2   :  { %3503 = verf.f32 %v561_v0  ;;  %v1078_v0 = vld [vmem:[%s4403_s8 + $0x8] sm:$0xff] }
 0x3a7   :  { %v3498_v31 = vpop.eup %3497 }
 0x3a8   :  { %v3500_v32 = vpop.eup %3499  ;;  %v568_v34 = vadd.f32 1.0, %v3498_v31  ;;  %v1079_v31 = vld [vmem:[%s4403_s8 + $0x10] sm:$0xff] }
 0x3a9   :  { %v567_v35 = vadd.f32 1.0, %v3500_v32  ;;  %v1080_v32 = vld [vmem:[%s4403_s8 + $0x18] sm:$0xff] }
 0x3aa   :  { %v572_v36 = vmul.f32 %v568_v34, %v556_v33  ;;  %v1081_v33 = vld [vmem:[%s4403_s8 + $0x20] sm:$0xff]  ;;  %v1082_v34 = vld [vmem:[%s4403_s8 + $0x28] sm:$0xff] }
 0x3ab   :  { %v3502_v37 = vpop.eup %3501  ;;  %v571_v38 = vmul.f32 %v567_v35, %v555_v4  ;;  %v1083_v4 = vld [vmem:[%s4403_s8 + $0x30] sm:$0xff]  ;;  %v1084_v35 = vld [vmem:[%s4403_s8 + $0x38] sm:$0xff] }
 0x3ac   :  { %v3504_v2 = vpop.eup %3503  ;;  %v570_v40 = vadd.f32 1.0, %v3502_v37  ;;  %579 = vrot.lane.b32.xlu1 %v572_v36, %s3526_s5  ;;  %v1654_v37 = vld [vmem:[%s4404_s11 + $0x8] sm:$0xff] }
 0x3ad   :  { %v569_v42 = vadd.f32 1.0, %v3504_v2  ;;  %576 = vrot.lane.b32.xlu0 %v571_v38, %s3526_s5  ;;  %v3241_v43 = vpack.c.bf16 %v572_v36, %v571_v38  ;;  %v1656_v2 = vld [vmem:[%s4404_s11 + $0x18] sm:$0xff] }
 0x3ae   :  { %v574_v44 = vmul.f32 %v570_v40, %v558_v39  ;;  %v1657_v39 = vld [vmem:[%s4404_s11 + $0x20] sm:$0xff]  ;;  %v1658_v40 = vld [vmem:[%s4404_s11 + $0x28] sm:$0xff] }
 0x3af   :  { %v573_v45 = vmul.f32 %v569_v42, %v557_v41  ;;  %3242 = vmatprep.subr.bf16.mxu1 %v3241_v43  ;;  %v1659_v41 = vld [vmem:[%s4404_s11 + $0x30] sm:$0xff]  ;;  %v1660_v42 = vld [vmem:[%s4404_s11 + $0x38] sm:$0xff] }
 0x3b0   :  { %3244 = vmatpush3.bf16.msra.mxu1 %v3241_v43  ;;  %585 = vrot.lane.b32.xlu1 %v574_v44, %s3526_s5 }
 0x3b1   :  { %582 = vrot.lane.b32.xlu0 %v573_v45, %s3526_s5  ;;  %v3245_v46 = vpack.c.bf16 %v574_v44, %v573_v45 }
 0x3b3   :  { %3246 = vmatprep.subr.bf16.mxu1 %v3245_v46 }
 0x3b4   :  { %3248 = vmatpush3.bf16.msra.mxu1 %v3245_v46 }
 0x3b5   :  { %605 = vrot.lane.b32.xlu0 %v2588_v47, %s3527_s22 }
 0x3b7   :  { %2962 = vmatmul.mubr.msk.f32.vlgmr.msra.gmra.mrb[8].mxu1 %vm170_vm1, %v2591_v58  ;;  %v625_v58 = vld [vmem:[%s4402_s7 + $0x8] sm:$0xff] }
 0x3b8   :  { %2964 = vmatprep.mubr.msk.f32.mxu1 %vm170_vm1, %v2592_v59  ;;  %v626_v59 = vld [vmem:[%s4402_s7 + $0x10] sm:$0xff] }
 0x3bb   :  { %2965 = vmatmul.mubr.msk.f32.gmra.mrb[10].mxu1 %vm170_vm1, %v2593_v60 }
 0x3bc   :  { %2967 = vmatprep.mubr.msk.f32.mxu1 %vm170_vm1, %v2594_v62  ;;  %v627_v62 = vld [vmem:[%s4402_s7 + $0x18] sm:$0xff] }
 0x3bf   :  { %2968 = vmatmul.mubr.msk.f32.gmra.mrb[12].mxu1 %vm170_vm1, %v2595_v63  ;;  %v628_v63 = vld [vmem:[%s4402_s7 + $0x20] sm:$0xff] }
 0x3c0   :  { %2970 = vmatprep.mubr.msk.f32.mxu1 %vm170_vm1, %v2596_v6  ;;  %v630_v6 = vld [vmem:[%s4402_s7 + $0x30] sm:$0xff] }
 0x3c3   :  { %2971 = vmatmul.mubr.msk.f32.gmra.mrb[14].mxu1 %vm170_vm1, %v2597_v10  ;;  %v2615_v10 = vld [vmem:[%s4402_s7 + $0x88] sm:$0xff] }
 0x3c4   :  { %2981 = vmatprep.mubr.msk.f32.mxu1 %vm170_vm1, %v624_v14  ;;  %v2619_v14 = vld [vmem:[%s4402_s7 + $0xa8] sm:$0xff] }
 0x41e   :  { %v580_v48 = vpop.permute.xlu1 %579 }
 0x41f   :  { %v577_v49 = vpop.permute.xlu0 %576  ;;  %v581_v50 = vsel %vm575_vm4, %v580_v48, %v572_v36 }
 0x420   :  { %590 = vrot.lane.b32.xlu1 %v581_v50, %s3526_s5  ;;  %v578_v51 = vsel %vm575_vm4, %v577_v49, %v571_v38 }
 0x421   :  { %588 = vrot.lane.b32.xlu0 %v578_v51, %s3526_s5 }
 0x422   :  { %v586_v52 = vpop.permute.xlu1 %585 }
 0x423   :  { %v583_v53 = vpop.permute.xlu0 %582  ;;  %v587_v54 = vsel %vm575_vm4, %v586_v52, %v574_v44 }
 0x424   :  { %v584_v55 = vsel %vm575_vm4, %v583_v53, %v573_v45 }
 0x425   :  { %594 = vrot.lane.b32.xlu0 %v587_v54, %s3526_s5  ;;  %592 = vrot.lane.b32.xlu1 %v584_v55, %s3526_s5 }
 0x427   :  { %v3797_v61 = vpop.permute.xlu0 %605 }
 0x429   :  { %617 = vrot.lane.b32.xlu1 %v2589_v56, %s3528_s3  ;;  %s3530_s3 = smov 127  }
 0x492   :  { %v591_v5 = vpop.permute.xlu1 %590 }
 0x493   :  { %v597_v7 = vsel %vm575_vm4, %v591_v5, %v572_v36  ;;  %v589_v9 = vpop.permute.xlu0 %588  ;;  %v1653_v36 = vld [vmem:[%s4404_s11] sm:$0xff]  ;;  %v629_v5 = vld [vmem:[%s4402_s7 + $0x28] sm:$0xff] }
 0x494   :  { %v609_v11 = vmul.f32 %v3797_v61, %v597_v7  ;;  %v596_v12 = vsel %vm575_vm4, %v589_v9, %v571_v38  ;;  %v1655_v38 = vld [vmem:[%s4404_s11 + $0x10] sm:$0xff]  ;;  %v2614_v9 = vld [vmem:[%s4402_s7 + $0x80] sm:$0xff] }
 0x495   :  { %v608_v13 = vmul.f32 %v3797_v61, %v596_v12 }
 0x497   :  { %v593_v15 = vpop.permute.xlu1 %592  ;;  %v595_v16 = vpop.permute.xlu0 %594  ;;  %v3433_v17 = vpack.i.bf16 %v609_v11, %v608_v13  ;;  %v2616_v11 = vld [vmem:[%s4402_s7 + $0x90] sm:$0xff]  ;;  %v2618_v13 = vld [vmem:[%s4402_s7 + $0xa0] sm:$0xff] }
 0x498   :  { %v598_v18 = vsel %vm575_vm4, %v593_v15, %v573_v45  ;;  %v599_v19 = vsel %vm575_vm4, %v595_v16, %v574_v44  ;;  %v2620_v15 = vld [vmem:[%s4402_s7 + $0xb0] sm:$0xff]  ;;  %v2621_v16 = vld [vmem:[%s4402_s7 + $0xb8] sm:$0xff] }
 0x499   :  { %v610_v20 = vmul.f32 %v3797_v61, %v598_v18  ;;  %v611_v21 = vmul.f32 %v3797_v61, %v599_v19  ;;  %3434 = vrot.lane.b32.xlu0 %v3433_v17, %s3529_s24  ;;  %v1141_v17 = vld [vmem:[%s4405_s9] sm:$0xff] }
 0x49b   :  { %v3828_v22 = vpop.permute.xlu1 %617  ;;  %v3438_v23 = vpack.i.bf16 %v611_v21, %v610_v20 }
 0x49c   :  { %v620_v24 = vmul.f32 %v3828_v22, %v596_v12  ;;  %v621_v25 = vmul.f32 %v3828_v22, %v597_v7  ;;  %v622_v27 = vmul.f32 %v3828_v22, %v598_v18  ;;  %v623_v28 = vmul.f32 %v3828_v22, %v599_v19  ;;  %v631_v7 = vld [vmem:[%s4402_s7 + $0x38] sm:$0xff] }
 0x49d   :  { %3439 = vrot.lane.b32.xlu1 %v3438_v23, %s3529_s24  ;;  %v2617_v12 = vld [vmem:[%s4402_s7 + $0x98] sm:$0xff] }
 0x49e   :  { %v3443_v1 = vpack.i.bf16 %v621_v25, %v620_v24  ;;  %v3448_v29 = vpack.i.bf16 %v623_v28, %v622_v27 }
 0x4a0   :  { %3444 = vrot.lane.b32.xlu0 %v3443_v1, %s3530_s3 }
 0x4a1   :  { %3449 = vrot.lane.b32.xlu1 %v3448_v29, %s3530_s3 }
 0x4a4   :  { %1087 = vperm.xlu0 %3431, %v1077_v30  }
 0x4a5   :  { %1092 = vperm.xlu1 %3432, %v1078_v0  }
 0x4a8   :  { %1097 = vperm.xlu0 %3431, %v1079_v31  }
 0x4a9   :  { %1102 = vperm.xlu1 %3432, %v1080_v32  }
 0x4ac   :  { %1107 = vperm.xlu0 %3431, %v1081_v33  }
 0x4ad   :  { %1112 = vperm.xlu1 %3432, %v1082_v34  }
 0x4b0   :  { %1117 = vperm.xlu0 %3431, %v1083_v4  }
 0x4b1   :  { %1122 = vperm.xlu1 %3432, %v1084_v35  }
 0x4b4   :  { %1663 = vperm.xlu0 %3431, %v1653_v36  }
 0x4b5   :  { %1668 = vperm.xlu1 %3432, %v1654_v37  }
 0x4b8   :  { %1673 = vperm.xlu0 %3431, %v1655_v38  }
 0x4b9   :  { %1678 = vperm.xlu1 %3432, %v1656_v2  }
 0x4bc   :  { %1683 = vperm.xlu0 %3431, %v1657_v39  }
 0x4bd   :  { %1688 = vperm.xlu1 %3432, %v1658_v40  }
 0x4c0   :  { %1693 = vperm.xlu0 %3431, %v1659_v41  }
 0x4c1   :  { %1698 = vperm.xlu1 %3432, %v1660_v42  }
 0x50b   :  { %v3435_v43 = vpop.permute.xlu0 %3434 }
 0x50c   :  { %v3437_v44 = vunpack.i.h.bf16 %v3435_v43  ;;  %v3436_v45 = vunpack.i.l.bf16 %v3435_v43 }
 0x50e   :  { %v3249_v46 = vpack.c.bf16 %v3437_v44, %v3436_v45 }
 0x50f   :  { %v3440_v47 = vpop.permute.xlu1 %3439 }
 0x510   :  { %v3442_v48 = vunpack.i.h.bf16 %v3440_v47  ;;  %v3441_v49 = vunpack.i.l.bf16 %v3440_v47  ;;  %3250 = vmatprep.subr.bf16.mxu1 %v3249_v46 }
 0x511   :  { %3252 = vmatpush3.bf16.msra.mxu1 %v3249_v46 }
 0x512   :  { %v3253_v50 = vpack.c.bf16 %v3442_v48, %v3441_v49  ;;  %v3445_v51 = vpop.permute.xlu0 %3444 }
 0x513   :  { %v3447_v52 = vunpack.i.h.bf16 %v3445_v51  ;;  %v3446_v53 = vunpack.i.l.bf16 %v3445_v51  ;;  %v3450_v54 = vpop.permute.xlu1 %3449 }
 0x514   :  { %v3452_v55 = vunpack.i.h.bf16 %v3450_v54  ;;  %v3451_v56 = vunpack.i.l.bf16 %v3450_v54  ;;  %3254 = vmatprep.subr.bf16.mxu1 %v3253_v50 }
 0x515   :  { %v3257_v57 = vpack.c.bf16 %v3447_v52, %v3446_v53  ;;  %3256 = vmatpush3.bf16.msra.mxu1 %v3253_v50 }
 0x516   :  { %v3261_v60 = vpack.c.bf16 %v3452_v55, %v3451_v56  ;;  %v1142_v56 = vld [vmem:[%s4405_s9 + $0x8] sm:$0xff] }
 0x517   :  { %3258 = vmatprep.subr.bf16.mxu1 %v3257_v57 }
 0x518   :  { %2982 = vmatmul.mubr.msk.f32.vlgmr.msra.gmra.mrb[8].mxu1 %vm170_vm1, %v625_v58  ;;  %v1144_v58 = vld [vmem:[%s4405_s9 + $0x18] sm:$0xff] }
 0x519   :  { %3260 = vmatpush3.bf16.msra.mxu1 %v3257_v57  ;;  %2984 = vmatprep.mubr.msk.f32.mxu1 %vm170_vm1, %v626_v59  ;;  %v1143_v57 = vld [vmem:[%s4405_s9 + $0x10] sm:$0xff] }
 0x51a   :  { %3262 = vmatprep.subr.bf16.mxu1 %v3261_v60 }
 0x51c   :  { %2985 = vmatmul.mubr.msk.f32.gmra.mrb[10].mxu1 %vm170_vm1, %v627_v62 }
 0x51d   :  { %3264 = vmatpush3.bf16.msra.mxu1 %v3261_v60  ;;  %2987 = vmatprep.mubr.msk.f32.mxu1 %vm170_vm1, %v628_v63 }
 0x520   :  { %2988 = vmatmul.mubr.msk.f32.gmra.mrb[12].mxu1 %vm170_vm1, %v629_v5 }
 0x521   :  { %2990 = vmatprep.mubr.msk.f32.mxu1 %vm170_vm1, %v630_v6 }
 0x523   :  { %v1088_v19 = vpop.permute.xlu0 %1087 }
 0x524   :  { %2991 = vmatmul.mubr.msk.f32.gmra.mrb[14].mxu1 %vm170_vm1, %v631_v7  ;;  %v1093_v18 = vpop.permute.xlu1 %1092 }
 0x525   :  { %3001 = vmatprep.mubr.msk.f32.mxu1 %vm170_vm1, %v2614_v9 }
 0x527   :  { %v1098_v23 = vpop.permute.xlu0 %1097 }
 0x528   :  { %3002 = vmatmul.mubr.msk.f32.vlgmr.msra.gmra.mrb[8].mxu1 %vm170_vm1, %v2615_v10  ;;  %v1103_v20 = vpop.permute.xlu1 %1102 }
 0x529   :  { %3004 = vmatprep.mubr.msk.f32.mxu1 %vm170_vm1, %v2616_v11 }
 0x52b   :  { %v1108_v32 = vpop.permute.xlu0 %1107 }
 0x52c   :  { %3005 = vmatmul.mubr.msk.f32.gmra.mrb[10].mxu1 %vm170_vm1, %v2617_v12  ;;  %v1113_v0 = vpop.permute.xlu1 %1112 }
 0x52d   :  { %3007 = vmatprep.mubr.msk.f32.mxu1 %vm170_vm1, %v2618_v13 }
 0x52f   :  { %v1118_v39 = vpop.permute.xlu0 %1117 }
 0x530   :  { %3008 = vmatmul.mubr.msk.f32.gmra.mrb[12].mxu1 %vm170_vm1, %v2619_v14  ;;  %v1123_v37 = vpop.permute.xlu1 %1122 }
 0x531   :  { %3010 = vmatprep.mubr.msk.f32.mxu1 %vm170_vm1, %v2620_v15 }
 0x534   :  { %3011 = vmatmul.mubr.msk.f32.gmra.mrb[14].mxu1 %vm170_vm1, %v2621_v16 }
 0x535   :  { %3045 = vmatprep.mubr.f32.mxu1 %v1141_v17 }
 0x5fb   :  { %v3003_v21 = vpop.f32.mrb[8].mxu1 }
 0x5fc   :  { %v3948_v24 = vadd.f32 %v3003_v21, %v1093_v18  ;;  %v1030_v25 = vpop.f32.mrb[9].mxu1  ;;  %v1339_v21 = vld [vmem:[%s4406_s10] sm:$0xff] }
 0x5fd   :  { %v3950_v27 = vadd.f32 %v1088_v19, %v1030_v25 }
 0x5fe   :  { %v1134_v42 = vmul.f32 %v3948_v24, %v3948_v24 }
 0x5ff   :  { %v3006_v28 = vpop.f32.mrb[10].mxu1  ;;  %v3265_v1 = vpack.c.bf16 %v3948_v24, %v3950_v27  ;;  %v1133_v43 = vmul.f32 %v3950_v27, %v3950_v27 }
 0x600   :  { %v3954_v29 = vadd.f32 %v3006_v28, %v1103_v20  ;;  %v1040_v30 = vpop.f32.mrb[11].mxu1 }
 0x601   :  { %v3956_v31 = vadd.f32 %v1098_v23, %v1040_v30  ;;  %3266 = vmatprep.subr.bf16.mxu1 %v3265_v1  ;;  %v3281_v48 = vpack.c.bf16 %v1134_v42, %v1133_v43  ;;  %v1349_v42 = vld [vmem:[%s4406_s10 + $0x50] sm:$0xff]  ;;  %v1350_v43 = vld [vmem:[%s4406_s10 + $0x58] sm:$0xff] }
 0x602   :  { %3268 = vmatpush3.bf16.msra.mxu1 %v3265_v1  ;;  %v1136_v46 = vmul.f32 %v3954_v29, %v3954_v29 }
 0x603   :  { %v3009_v33 = vpop.f32.mrb[12].mxu1  ;;  %v3269_v34 = vpack.c.bf16 %v3954_v29, %v3956_v31  ;;  %v1135_v47 = vmul.f32 %v3956_v31, %v3956_v31 }
 0x604   :  { %v3960_v4 = vadd.f32 %v3009_v33, %v1113_v0  ;;  %v1050_v35 = vpop.f32.mrb[13].mxu1  ;;  %v1341_v33 = vld [vmem:[%s4406_s10 + $0x10] sm:$0xff] }
 0x605   :  { %v3962_v36 = vadd.f32 %v1108_v32, %v1050_v35  ;;  %3270 = vmatprep.subr.bf16.mxu1 %v3269_v34  ;;  %v3285_v51 = vpack.c.bf16 %v1136_v46, %v1135_v47  ;;  %v1340_v32 = vld [vmem:[%s4406_s10 + $0x8] sm:$0xff]  ;;  %v1343_v35 = vld [vmem:[%s4406_s10 + $0x20] sm:$0xff]  ;;  %v1353_v47 = vld [vmem:[%s4406_s10 + $0x70] sm:$0xff] }
 0x606   :  { %3272 = vmatpush3.bf16.msra.mxu1 %v3269_v34  ;;  %v1138_v49 = vmul.f32 %v3960_v4, %v3960_v4  ;;  %v1342_v34 = vld [vmem:[%s4406_s10 + $0x18] sm:$0xff]  ;;  %v1352_v46 = vld [vmem:[%s4406_s10 + $0x68] sm:$0xff] }
 0x607   :  { %v3012_v38 = vpop.f32.mrb[14].mxu1  ;;  %v3273_v2 = vpack.c.bf16 %v3960_v4, %v3962_v36  ;;  %v1137_v50 = vmul.f32 %v3962_v36, %v3962_v36 }
 0x608   :  { %v3966_v40 = vadd.f32 %v3012_v38, %v1123_v37  ;;  %v1060_v41 = vpop.f32.mrb[15].mxu1  ;;  %v1344_v37 = vld [vmem:[%s4406_s10 + $0x28] sm:$0xff]  ;;  %v1345_v38 = vld [vmem:[%s4406_s10 + $0x30] sm:$0xff] }
 0x609   :  { %v3972_v44 = vadd.f32 %v1118_v39, %v1060_v41  ;;  %3274 = vmatprep.subr.bf16.mxu1 %v3273_v2  ;;  %v3289_v54 = vpack.c.bf16 %v1138_v49, %v1137_v50  ;;  %v1347_v39 = vld [vmem:[%s4406_s10 + $0x40] sm:$0xff]  ;;  %v1348_v41 = vld [vmem:[%s4406_s10 + $0x48] sm:$0xff] }
 0x60a   :  { %3276 = vmatpush3.bf16.msra.mxu1 %v3273_v2  ;;  %v1140_v52 = vmul.f32 %v3966_v40, %v3966_v40  ;;  %v1346_v2 = vld [vmem:[%s4406_s10 + $0x38] sm:$0xff] }
 0x60b   :  { %v3277_v45 = vpack.c.bf16 %v3966_v40, %v3972_v44  ;;  %v1139_v53 = vmul.f32 %v3972_v44, %v3972_v44 }
 0x60d   :  { %3278 = vmatprep.subr.bf16.mxu1 %v3277_v45  ;;  %v3293_v55 = vpack.c.bf16 %v1140_v52, %v1139_v53 }
 0x60e   :  { %3280 = vmatpush3.bf16.msra.mxu1 %v3277_v45  ;;  %v1351_v45 = vld [vmem:[%s4406_s10 + $0x60] sm:$0xff] }
 0x60f   :  { %3282 = vmatprep.subr.bf16.mxu1 %v3281_v48 }
 0x612   :  { %3284 = vmatpush3.bf16.msra.mxu1 %v3281_v48  ;;  %v1354_v48 = vld [vmem:[%s4406_s10 + $0x78] sm:$0xff] }
 0x613   :  { %3286 = vmatprep.subr.bf16.mxu1 %v3285_v51 }
 0x616   :  { %3288 = vmatpush3.bf16.msra.mxu1 %v3285_v51 }
 0x617   :  { %3290 = vmatprep.subr.bf16.mxu1 %v3289_v54 }
 0x61a   :  { %3292 = vmatpush3.bf16.msra.mxu1 %v3289_v54 }
 0x61b   :  { %3294 = vmatprep.subr.bf16.mxu1 %v3293_v55 }
 0x61e   :  { %3296 = vmatpush3.bf16.msra.mxu1 %v3293_v55  ;;  %v1669_v55 = vpop.permute.xlu1 %1668 }
 0x621   :  { %3046 = vmatmul.mubr.f32.vlgmr.msra.gmra.mrb[16].mxu1 %v1142_v56  ;;  %v1664_v56 = vpop.permute.xlu0 %1663 }
 0x622   :  { %3048 = vmatprep.mubr.f32.mxu1 %v1143_v57 }
 0x625   :  { %3049 = vmatmul.mubr.f32.gmra.mrb[18].mxu1 %v1144_v58 }
 0x626   :  { %3081 = vmatprep.mubr.msk.f32.mxu1 %vm170_vm1, %v1339_v21 }
 0x6f4   :  { %v3047_v59 = vpop.f32.mrb[16].mxu1 }
 0x6f5   :  { %v1211_v60 = vpop.f32.mrb[17].mxu1 }
 0x6f6   :  { %3059 = vmatprep.mubr.msk.f32.mxu0 %vm170_vm1, %v1211_v60 }
 0x6f7   :  { %3060 = vmatmul.mubr.msk.f32.vlgmr.msra.gmra.mrb[12].mxu0 %vm170_vm1, %v3047_v59  ;;  %v1679_v59 = vpop.permute.xlu1 %1678 }
 0x6f8   :  { %v3050_v62 = vpop.f32.mrb[18].mxu1  ;;  %3066 = vmatpush3.msk.msra.mxu0 %vm301_vm2, %v3699_v26 }
 0x6f9   :  { %v1221_v63 = vpop.f32.mrb[19].mxu1 }
 0x6fa   :  { %3062 = vmatprep.mubr.msk.f32.mxu0 %vm170_vm1, %v1221_v63 }
 0x6fb   :  { %3063 = vmatmul.mubr.msk.f32.gmra.mrb[14].mxu0 %vm170_vm1, %v3050_v62  ;;  %v1674_v62 = vpop.permute.xlu0 %1673 }
 0x7ca   :  { %v3061_v5 = vpop.f32.mrb[12].mxu0 }
 0x7cb   :  { %v1308_v6 = vpop.f32.mrb[13].mxu0  ;;  %v1328_v7 = vmul.f32 %v3061_v5, %v3061_v5 }
 0x7cc   :  { %v1327_v9 = vmul.f32 %v1308_v6, %v1308_v6 }
 0x7ce   :  { %v3064_v10 = vpop.f32.mrb[14].mxu0 }
 0x7cf   :  { %v1330_v11 = vsub.f32 %v3064_v10, %v1328_v7  ;;  %v1318_v12 = vpop.f32.mrb[15].mxu0 }
 0x7d0   :  { %v1329_v13 = vsub.f32 %v1318_v12, %v1327_v9 }
 0x7d1   :  { %v1332_v14 = vmax.f32 %v1330_v11, 0.0 }
 0x7d2   :  { %v1331_v15 = vmax.f32 %v1329_v13, 0.0 }
 0x7d3   :  { %v1334_v16 = vadd.f32 1e-05, %v1332_v14 }
 0x7d4   :  { %v1333_v17 = vadd.f32 1e-05, %v1331_v15 }
 0x7d5   :  { %3505 = vrsqrt.f32 %v1334_v16 }
 0x7d6   :  { %3507 = vrsqrt.f32 %v1333_v17  ;;  %v1689_v17 = vpop.permute.xlu1 %1688 }
 0x7df   :  { %v3506_v26 = vpop.eup %3505 }
 0x7e0   :  { %v3508_v18 = vpop.eup %3507  ;;  %v1338_v19 = vmul.f32 %v3506_v26, %v3061_v5 }
 0x7e1   :  { %3067 = vmatprep.mubr.msk.f32.mxu0 %vm288_vm3, %v3508_v18  ;;  %v1337_v20 = vmul.f32 %v3508_v18, %v1308_v6 }
 0x7e2   :  { %3068 = vmatmul.mubr.msk.f32.vlgmr.msra.gmra.mrb[16].mxu0 %vm288_vm3, %v3506_v26 }
 0x7e3   :  { %3070 = vmatprep.mubr.msk.f32.mxu0 %vm288_vm3, %v1337_v20  ;;  %v1684_v20 = vpop.permute.xlu0 %1683 }
 0x7e6   :  { %3071 = vmatmul.mubr.msk.f32.gmra.mrb[18].mxu0 %vm288_vm3, %v1338_v19 }
 0x8b5   :  { %v3069_v23 = vpop.f32.mrb[16].mxu0 }
 0x8b6   :  { %v1433_v25 = vpop.f32.mrb[17].mxu0 }
 0x8b7   :  { %v3305_v28 = vpack.c.bf16 %v3069_v23, %v1433_v25 }
 0x8b9   :  { %v3072_v1 = vpop.f32.mrb[18].mxu0  ;;  %3306 = vmatprep.subr.bf16.mxu1 %v3305_v28 }
 0x8ba   :  { %v1443_v30 = vpop.f32.mrb[19].mxu0  ;;  %3308 = vmatpush3.bf16.msra.mxu1 %v3305_v28 }
 0x8bb   :  { %v3309_v0 = vpack.c.bf16 %v3072_v1, %v1443_v30 }
 0x8bd   :  { %3310 = vmatprep.subr.bf16.mxu1 %v3309_v0 }
 0x8be   :  { %3312 = vmatpush3.bf16.msra.mxu1 %v3309_v0 }
 0x8c1   :  { %3082 = vmatmul.mubr.msk.f32.vlgmr.msra.gmra.mrb[20].mxu1 %vm170_vm1, %v1340_v32 }
 0x8c2   :  { %3084 = vmatprep.mubr.msk.f32.mxu1 %vm170_vm1, %v1341_v33 }
 0x8c5   :  { %3085 = vmatmul.mubr.msk.f32.gmra.mrb[22].mxu1 %vm170_vm1, %v1342_v34 }
 0x8c6   :  { %3087 = vmatprep.mubr.msk.f32.mxu1 %vm170_vm1, %v1343_v35  ;;  %v1694_v35 = vpop.permute.xlu0 %1693 }
 0x8c9   :  { %3088 = vmatmul.mubr.msk.f32.gmra.mrb[24].mxu1 %vm170_vm1, %v1344_v37 }
 0x8ca   :  { %3090 = vmatprep.mubr.msk.f32.mxu1 %vm170_vm1, %v1345_v38 }
 0x8cd   :  { %3091 = vmatmul.mubr.msk.f32.gmra.mrb[26].mxu1 %vm170_vm1, %v1346_v2 }
 0x8ce   :  { %3093 = vmatprep.mubr.msk.f32.mxu1 %vm170_vm1, %v1347_v39 }
 0x8d1   :  { %3094 = vmatmul.mubr.msk.f32.gmra.mrb[28].mxu1 %vm170_vm1, %v1348_v41 }
 0x8d2   :  { %3096 = vmatprep.mubr.msk.f32.mxu1 %vm170_vm1, %v1349_v42 }
 0x8d5   :  { %3097 = vmatmul.mubr.msk.f32.gmra.mrb[30].mxu1 %vm170_vm1, %v1350_v43 }
 0x8d6   :  { %3099 = vmatprep.mubr.msk.f32.mxu1 %vm170_vm1, %v1351_v45 }
 0x8d9   :  { %3100 = vmatmul.mubr.msk.f32.gmra.mrb[32].mxu1 %vm170_vm1, %v1352_v46 }
 0x8da   :  { %3102 = vmatprep.mubr.msk.f32.mxu1 %vm170_vm1, %v1353_v47 }
 0x8dd   :  { %3103 = vmatmul.mubr.msk.f32.gmra.mrb[34].mxu1 %vm170_vm1, %v1354_v48 }
 0x994   :  { %v3083_v49 = vpop.f32.mrb[20].mxu1 }
 0x995   :  { %v1566_v50 = vpop.f32.mrb[21].mxu1  ;;  %v1646_v63 = vmul.f32 %v3083_v49, %v3948_v24 }
 0x996   :  { %v1645_v7 = vmul.f32 %v1566_v50, %v3950_v27 }
 0x998   :  { %v3086_v51 = vpop.f32.mrb[22].mxu1 }
 0x999   :  { %v1576_v52 = vpop.f32.mrb[23].mxu1  ;;  %v1648_v13 = vmul.f32 %v3086_v51, %v3954_v29 }
 0x99a   :  { %v1647_v26 = vmul.f32 %v1576_v52, %v3956_v31  ;;  %v1699_v31 = vpop.permute.xlu1 %1698 }
 0x99c   :  { %v3089_v53 = vpop.f32.mrb[24].mxu1 }
 0x99d   :  { %v1586_v54 = vpop.f32.mrb[25].mxu1  ;;  %v1650_v23 = vmul.f32 %v3089_v53, %v3960_v4 }
 0x99e   :  { %v1649_v29 = vmul.f32 %v1586_v54, %v3962_v36 }
 0x9a0   :  { %v3092_v57 = vpop.f32.mrb[26].mxu1 }
 0x9a1   :  { %v1596_v58 = vpop.f32.mrb[27].mxu1  ;;  %v1652_v37 = vmul.f32 %v3092_v57, %v3966_v40 }
 0x9a2   :  { %v1651_v4 = vmul.f32 %v1596_v58, %v3972_v44 }
 0x9a4   :  { %v3095_v60 = vpop.f32.mrb[28].mxu1 }
 0x9a5   :  { %v1702_v5 = vsub.f32 %v1669_v55, %v3095_v60  ;;  %v1606_v6 = vpop.f32.mrb[29].mxu1 }
 0x9a6   :  { %v1701_v9 = vsub.f32 %v1664_v56, %v1606_v6 }
 0x9a7   :  { %v1710_v10 = vadd.f32 %v1702_v5, %v1646_v63 }
 0x9a8   :  { %v1709_v11 = vadd.f32 %v1701_v9, %v1645_v7  ;;  %v3098_v12 = vpop.f32.mrb[30].mxu1 }
 0x9a9   :  { %v1726_v14 = vmul.f32 0.70710677, %v1710_v10  ;;  %v1704_v15 = vsub.f32 %v1679_v59, %v3098_v12  ;;  %v1616_v16 = vpop.f32.mrb[31].mxu1  ;;  %v1718_v48 = vmul.f32 0.5, %v1710_v10 }
 0x9aa   :  { %v1725_v18 = vmul.f32 0.70710677, %v1709_v11  ;;  %v1703_v19 = vsub.f32 %v1674_v62, %v1616_v16  ;;  %v1717_v51 = vmul.f32 0.5, %v1709_v11 }
 0x9ab   :  { %3509 = verf.f32 %v1726_v14  ;;  %v1712_v24 = vadd.f32 %v1704_v15, %v1648_v13 }
 0x9ac   :  { %3511 = verf.f32 %v1725_v18  ;;  %v1711_v21 = vadd.f32 %v1703_v19, %v1647_v26  ;;  %v3101_v27 = vpop.f32.mrb[32].mxu1 }
 0x9ad   :  { %v1728_v25 = vmul.f32 0.70710677, %v1712_v24  ;;  %v1706_v28 = vsub.f32 %v1689_v17, %v3101_v27  ;;  %v1626_v1 = vpop.f32.mrb[33].mxu1  ;;  %v1720_v55 = vmul.f32 0.5, %v1712_v24 }
 0x9ae   :  { %v1727_v30 = vmul.f32 0.70710677, %v1711_v21  ;;  %v1705_v0 = vsub.f32 %v1684_v20, %v1626_v1  ;;  %v1719_v57 = vmul.f32 0.5, %v1711_v21 }
 0x9af   :  { %3513 = verf.f32 %v1728_v25  ;;  %v1714_v32 = vadd.f32 %v1706_v28, %v1650_v23 }
 0x9b0   :  { %3515 = verf.f32 %v1727_v30  ;;  %v1713_v33 = vadd.f32 %v1705_v0, %v1649_v29  ;;  %v3104_v34 = vpop.f32.mrb[34].mxu1 }
 0x9b1   :  { %v1730_v38 = vmul.f32 0.70710677, %v1714_v32  ;;  %v1708_v2 = vsub.f32 %v1699_v31, %v3104_v34  ;;  %v1636_v39 = vpop.f32.mrb[35].mxu1  ;;  %v1722_v6 = vmul.f32 0.5, %v1714_v32 }
 0x9b2   :  { %v1729_v41 = vmul.f32 0.70710677, %v1713_v33  ;;  %v1707_v42 = vsub.f32 %v1694_v35, %v1636_v39  ;;  %v1721_v9 = vmul.f32 0.5, %v1713_v33  ;;  %v2655_v39 = vld [vmem:[%s4407_s12 + $0x40] sm:$0xff] }
 0x9b3   :  { %3517 = verf.f32 %v1730_v38  ;;  %v1716_v36 = vadd.f32 %v1708_v2, %v1652_v37  ;;  %3121 = vmatprep.mubr.msk.f32.mxu0 %vm72_vm0, %v2655_v39  ;;  %v2376_v39 = vld [vmem:[%s4409_s15 + $0x30] sm:$0xff] }
 0x9b4   :  { %3519 = verf.f32 %v1729_v41  ;;  %v1715_v43 = vadd.f32 %v1707_v42, %v1651_v4  ;;  %v2656_v4 = vld [vmem:[%s4407_s12 + $0x48] sm:$0xff]  ;;  %v2657_v42 = vld [vmem:[%s4407_s12 + $0x50] sm:$0xff] }
 0x9b5   :  { %v3510_v45 = vpop.eup %3509  ;;  %v1732_v46 = vmul.f32 0.70710677, %v1716_v36  ;;  %v1724_v16 = vmul.f32 0.5, %v1716_v36 }
 0x9b6   :  { %v3512_v47 = vpop.eup %3511  ;;  %v1742_v49 = vadd.f32 1.0, %v3510_v45  ;;  %v1731_v50 = vmul.f32 0.70710677, %v1715_v43  ;;  %v1723_v26 = vmul.f32 0.5, %v1715_v43  ;;  %v2658_v45 = vld [vmem:[%s4407_s12 + $0x58] sm:$0xff] }
 0x9b7   :  { %v1741_v52 = vadd.f32 1.0, %v3512_v47  ;;  %3521 = verf.f32 %v1732_v46 }
 0x9b8   :  { %v4079_v40 = vmul.f32 %v1742_v49, %v1718_v48  ;;  %3523 = verf.f32 %v1731_v50  ;;  %v2659_v50 = vld [vmem:[%s4407_s12 + $0x60] sm:$0xff] }
 0x9b9   :  { %v3514_v53 = vpop.eup %3513  ;;  %v4081_v44 = vmul.f32 %v1741_v52, %v1717_v51 }
 0x9ba   :  { %v3516_v54 = vpop.eup %3515  ;;  %v1744_v56 = vadd.f32 1.0, %v3514_v53  ;;  %1760 = vrot.lane.b32.xlu1 %v4079_v40, %s3526_s5  ;;  %v2660_v53 = vld [vmem:[%s4407_s12 + $0x68] sm:$0xff] }
 0x9bb   :  { %v1743_v58 = vadd.f32 1.0, %v3516_v54  ;;  %1757 = vrot.lane.b32.xlu0 %v4081_v44, %s3526_s5  ;;  %v3313_v59 = vpack.c.bf16 %v4079_v40, %v4081_v44 }
 0x9bc   :  { %v4089_v60 = vmul.f32 %v1744_v56, %v1720_v55 }
 0x9bd   :  { %v3518_v62 = vpop.eup %3517  ;;  %v4091_v63 = vmul.f32 %v1743_v58, %v1719_v57  ;;  %3314 = vmatprep.subr.bf16.mxu0 %v3313_v59  ;;  %v2661_v57 = vld [vmem:[%s4407_s12 + $0x70] sm:$0xff] }
 0x9be   :  { %v3520_v5 = vpop.eup %3519  ;;  %v1746_v7 = vadd.f32 1.0, %v3518_v62  ;;  %3316 = vmatpush3.bf16.msra.mxu0 %v3313_v59  ;;  %1766 = vrot.lane.b32.xlu1 %v4089_v60, %s3526_s5  ;;  %v2662_v62 = vld [vmem:[%s4407_s12 + $0x78] sm:$0xff] }
 0x9bf   :  { %v1745_v10 = vadd.f32 1.0, %v3520_v5  ;;  %1763 = vrot.lane.b32.xlu0 %v4091_v63, %s3526_s5  ;;  %v3317_v11 = vpack.c.bf16 %v4089_v60, %v4091_v63 }
 0x9c0   :  { %v4099_v12 = vmul.f32 %v1746_v7, %v1722_v6 }
 0x9c1   :  { %v3522_v13 = vpop.eup %3521  ;;  %v4101_v14 = vmul.f32 %v1745_v10, %v1721_v9  ;;  %3318 = vmatprep.subr.bf16.mxu0 %v3317_v11 }
 0x9c2   :  { %v3524_v15 = vpop.eup %3523  ;;  %v1748_v17 = vadd.f32 1.0, %v3522_v13  ;;  %3320 = vmatpush3.bf16.msra.mxu0 %v3317_v11  ;;  %1772 = vrot.lane.b32.xlu1 %v4099_v12, %s3526_s5  ;;  %v1821_v11 = vld [vmem:[%s4407_s12] sm:$0xff] }
 0x9c3   :  { %v1747_v18 = vadd.f32 1.0, %v3524_v15  ;;  %1769 = vrot.lane.b32.xlu0 %v4101_v14, %s3526_s5  ;;  %v3321_v19 = vpack.c.bf16 %v4099_v12, %v4101_v14 }
 0x9c4   :  { %v4109_v20 = vmul.f32 %v1748_v17, %v1724_v16 }
 0x9c5   :  { %v4111_v24 = vmul.f32 %v1747_v18, %v1723_v26  ;;  %3322 = vmatprep.subr.bf16.mxu0 %v3321_v19 }
 0x9c6   :  { %3324 = vmatpush3.bf16.msra.mxu0 %v3321_v19  ;;  %1778 = vrot.lane.b32.xlu1 %v4109_v20, %s3526_s5 }
 0x9c7   :  { %1775 = vrot.lane.b32.xlu0 %v4111_v24, %s3526_s5  ;;  %v3325_v21 = vpack.c.bf16 %v4109_v20, %v4111_v24 }
 0x9c9   :  { %3326 = vmatprep.subr.bf16.mxu0 %v3325_v21 }
 0x9ca   :  { %3328 = vmatpush3.bf16.msra.mxu0 %v3325_v21 }
 0x9cd   :  { %3122 = vmatmul.mubr.msk.f32.vlgmr.msra.gmra.mrb[20].mxu0 %vm72_vm0, %v2656_v4  ;;  %v2375_v4 = vld [vmem:[%s4409_s15 + $0x28] sm:$0xff] }
 0x9ce   :  { %3124 = vmatprep.mubr.msk.f32.mxu0 %vm72_vm0, %v2657_v42 }
 0x9d1   :  { %3125 = vmatmul.mubr.msk.f32.gmra.mrb[22].mxu0 %vm72_vm0, %v2658_v45 }
 0x9d2   :  { %3127 = vmatprep.mubr.msk.f32.mxu0 %vm72_vm0, %v2659_v50 }
 0x9d5   :  { %3128 = vmatmul.mubr.msk.f32.gmra.mrb[24].mxu0 %vm72_vm0, %v2660_v53 }
 0x9d6   :  { %3130 = vmatprep.mubr.msk.f32.mxu0 %vm72_vm0, %v2661_v57 }
 0x9d9   :  { %3131 = vmatmul.mubr.msk.f32.gmra.mrb[26].mxu0 %vm72_vm0, %v2662_v62 }
 0x9da   :  { %3149 = vmatprep.mubr.msk.f32.mxu0 %vm72_vm0, %v1821_v11 }
 0xa2c   :  { %v1761_v27 = vpop.permute.xlu1 %1760 }
 0xa2d   :  { %v1758_v23 = vpop.permute.xlu0 %1757  ;;  %v1762_v25 = vsel %vm575_vm4, %v1761_v27, %v4079_v40 }
 0xa2e   :  { %1783 = vrot.lane.b32.xlu1 %v1762_v25, %s3526_s5  ;;  %v1759_v28 = vsel %vm575_vm4, %v1758_v23, %v4081_v44 }
 0xa2f   :  { %1781 = vrot.lane.b32.xlu0 %v1759_v28, %s3526_s5  ;;  %v2306_v28 = vld [vmem:[%s4408_s13] sm:$0xff] }
 0xa30   :  { %v1767_v1 = vpop.permute.xlu1 %1766 }
 0xa31   :  { %v1764_v29 = vpop.permute.xlu0 %1763  ;;  %v1768_v30 = vsel %vm575_vm4, %v1767_v1, %v4089_v60 }
 0xa32   :  { %1787 = vrot.lane.b32.xlu1 %v1768_v30, %s3526_s5  ;;  %v1765_v0 = vsel %vm575_vm4, %v1764_v29, %v4091_v63  ;;  %v2308_v29 = vld [vmem:[%s4408_s13 + $0x10] sm:$0xff]  ;;  %v2310_v30 = vld [vmem:[%s4408_s13 + $0x20] sm:$0xff] }
 0xa33   :  { %1785 = vrot.lane.b32.xlu0 %v1765_v0, %s3526_s5  ;;  %v2309_v0 = vld [vmem:[%s4408_s13 + $0x18] sm:$0xff] }
 0xa34   :  { %v1773_v32 = vpop.permute.xlu1 %1772 }
 0xa35   :  { %v1770_v31 = vpop.permute.xlu0 %1769  ;;  %v1774_v33 = vsel %vm575_vm4, %v1773_v32, %v4099_v12  ;;  %v2312_v32 = vld [vmem:[%s4408_s13 + $0x30] sm:$0xff] }
 0xa36   :  { %1791 = vrot.lane.b32.xlu1 %v1774_v33, %s3526_s5  ;;  %v1771_v34 = vsel %vm575_vm4, %v1770_v31, %v4101_v14  ;;  %v2311_v31 = vld [vmem:[%s4408_s13 + $0x28] sm:$0xff]  ;;  %v2370_v33 = vld [vmem:[%s4409_s15] sm:$0xff] }
 0xa37   :  { %1789 = vrot.lane.b32.xlu0 %v1771_v34, %s3526_s5  ;;  %v2313_v34 = vld [vmem:[%s4408_s13 + $0x38] sm:$0xff] }
 0xa38   :  { %v1779_v35 = vpop.permute.xlu1 %1778 }
 0xa39   :  { %v1776_v37 = vpop.permute.xlu0 %1775  ;;  %v1780_v38 = vsel %vm575_vm4, %v1779_v35, %v4109_v20  ;;  %v2372_v35 = vld [vmem:[%s4409_s15 + $0x10] sm:$0xff] }
 0xa3a   :  { %1795 = vrot.lane.b32.xlu1 %v1780_v38, %s3526_s5  ;;  %v1777_v2 = vsel %vm575_vm4, %v1776_v37, %v4111_v24  ;;  %v2371_v37 = vld [vmem:[%s4409_s15 + $0x8] sm:$0xff]  ;;  %v2374_v38 = vld [vmem:[%s4409_s15 + $0x20] sm:$0xff] }
 0xa3b   :  { %1793 = vrot.lane.b32.xlu0 %v1777_v2, %s3526_s5  ;;  %v2373_v2 = vld [vmem:[%s4409_s15 + $0x18] sm:$0xff] }
 0xaa0   :  { %v1784_v41 = vpop.permute.xlu1 %1783 }
 0xaa1   :  { %v1798_v36 = vsel %vm575_vm4, %v1784_v41, %v4079_v40  ;;  %v1782_v43 = vpop.permute.xlu0 %1781  ;;  %v2377_v41 = vld [vmem:[%s4409_s15 + $0x38] sm:$0xff] }
 0xaa2   :  { %v1806_v46 = vmul.f32 %v1798_v36, %v3797_v61  ;;  %v1797_v47 = vsel %vm575_vm4, %v1782_v43, %v4081_v44  ;;  %v1814_v7 = vmul.f32 %v1798_v36, %v3828_v22 }
 0xaa3   :  { %v1805_v48 = vmul.f32 %v1797_v47, %v3797_v61  ;;  %v1813_v9 = vmul.f32 %v1797_v47, %v3828_v22 }
 0xaa4   :  { %v1788_v49 = vpop.permute.xlu1 %1787 }
 0xaa5   :  { %v1800_v51 = vsel %vm575_vm4, %v1788_v49, %v4089_v60  ;;  %v1786_v52 = vpop.permute.xlu0 %1785  ;;  %v3453_v40 = vpack.i.bf16 %v1806_v46, %v1805_v48  ;;  %v3473_v18 = vpack.i.bf16 %v1814_v7, %v1813_v9  ;;  %v1823_v7 = vld [vmem:[%s4407_s12 + $0x10] sm:$0xff] }
 0xaa6   :  { %v1808_v44 = vmul.f32 %v1800_v51, %v3797_v61  ;;  %v1799_v54 = vsel %vm575_vm4, %v1786_v52, %v4091_v63  ;;  %v1816_v26 = vmul.f32 %v1800_v51, %v3828_v22 }
 0xaa7   :  { %v1807_v55 = vmul.f32 %v1799_v54, %v3797_v61  ;;  %3454 = vrot.lane.b32.xlu0 %v3453_v40, %s3529_s24  ;;  %v1815_v19 = vmul.f32 %v1799_v54, %v3828_v22 }
 0xaa8   :  { %v1792_v56 = vpop.permute.xlu1 %1791 }
 0xaa9   :  { %v1802_v58 = vsel %vm575_vm4, %v1792_v56, %v4099_v12  ;;  %v1790_v59 = vpop.permute.xlu0 %1789  ;;  %v3458_v60 = vpack.i.bf16 %v1808_v44, %v1807_v55  ;;  %v3478_v25 = vpack.i.bf16 %v1816_v26, %v1815_v19  ;;  %v1826_v26 = vld [vmem:[%s4407_s12 + $0x28] sm:$0xff] }
 0xaaa   :  { %v1810_v63 = vmul.f32 %v1802_v58, %v3797_v61  ;;  %v1801_v5 = vsel %vm575_vm4, %v1790_v59, %v4101_v14 }
 0xaab   :  { %v1809_v6 = vmul.f32 %v1801_v5, %v3797_v61  ;;  %3459 = vrot.lane.b32.xlu1 %v3458_v60, %s3529_s24  ;;  %v1817_v21 = vmul.f32 %v1801_v5, %v3828_v22 }
 0xaac   :  { %v1796_v10 = vpop.permute.xlu1 %1795 }
 0xaad   :  { %v1804_v12 = vsel %vm575_vm4, %v1796_v10, %v4109_v20  ;;  %v1794_v13 = vpop.permute.xlu0 %1793  ;;  %v3463_v14 = vpack.i.bf16 %v1810_v63, %v1809_v6  ;;  %v1818_v20 = vmul.f32 %v1802_v58, %v3828_v22  ;;  %v1822_v6 = vld [vmem:[%s4407_s12 + $0x8] sm:$0xff] }
 0xaae   :  { %v1812_v15 = vmul.f32 %v1804_v12, %v3797_v61  ;;  %v1803_v16 = vsel %vm575_vm4, %v1794_v13, %v4111_v24  ;;  %v1820_v24 = vmul.f32 %v1804_v12, %v3828_v22  ;;  %v1824_v13 = vld [vmem:[%s4407_s12 + $0x18] sm:$0xff] }
 0xaaf   :  { %v1811_v17 = vmul.f32 %v1803_v16, %v3797_v61  ;;  %3464 = vrot.lane.b32.xlu0 %v3463_v14, %s3529_s24  ;;  %v1819_v61 = vmul.f32 %v1803_v16, %v3828_v22  ;;  %v3483_v23 = vpack.i.bf16 %v1818_v20, %v1817_v21  ;;  %v2307_v22 = vld [vmem:[%s4408_s13 + $0x8] sm:$0xff]  ;;  %v1825_v14 = vld [vmem:[%s4407_s12 + $0x20] sm:$0xff]  ;;  %v1828_v20 = vld [vmem:[%s4407_s12 + $0x38] sm:$0xff] }
 0xab0   :  { %v2679_v21 = vld [vmem:[%s4407_s12 + $0x80] sm:$0xff] }
 0xab1   :  { %v3468_v27 = vpack.i.bf16 %v1812_v15, %v1811_v17  ;;  %v3488_v1 = vpack.i.bf16 %v1820_v24, %v1819_v61  ;;  %v2681_v24 = vld [vmem:[%s4407_s12 + $0x90] sm:$0xff]  ;;  %v2682_v61 = vld [vmem:[%s4407_s12 + $0x98] sm:$0xff] }
 0xab3   :  { %3474 = vrot.lane.b32.xlu0 %v3473_v18, %s3530_s3  ;;  %3469 = vrot.lane.b32.xlu1 %v3468_v27, %s3529_s24  ;;  %v1827_v18 = vld [vmem:[%s4407_s12 + $0x30] sm:$0xff]  ;;  %v2680_v27 = vld [vmem:[%s4407_s12 + $0x88] sm:$0xff] }
 0xab7   :  { %3484 = vrot.lane.b32.xlu0 %v3483_v23, %s3530_s3  ;;  %3479 = vrot.lane.b32.xlu1 %v3478_v25, %s3530_s3  ;;  %v2683_v23 = vld [vmem:[%s4407_s12 + $0xa0] sm:$0xff]  ;;  %v2684_v25 = vld [vmem:[%s4407_s12 + $0xa8] sm:$0xff] }
 0xabb   :  { %2316 = vperm.xlu0 %3431, %v2306_v28   ;;  %3489 = vrot.lane.b32.xlu1 %v3488_v1, %s3530_s3  ;;  %v2686_v28 = vld [vmem:[%s4407_s12 + $0xb8] sm:$0xff]  ;;  %v2362_v1 = vld [vmem:[%s4410_s14] sm:$0xff] }
 0xabf   :  { %2326 = vperm.xlu0 %3431, %v2308_v29   ;;  %2321 = vperm.xlu1 %3432, %v2307_v22   ;;  %v2364_v29 = vld [vmem:[%s4410_s14 + $0x10] sm:$0xff]  ;;  %v2365_v22 = vld [vmem:[%s4410_s14 + $0x18] sm:$0xff] }
 0xac3   :  { %2336 = vperm.xlu0 %3431, %v2310_v30   ;;  %2331 = vperm.xlu1 %3432, %v2309_v0   ;;  %v2366_v30 = vld [vmem:[%s4410_s14 + $0x20] sm:$0xff]  ;;  %v2367_v0 = vld [vmem:[%s4410_s14 + $0x28] sm:$0xff] }
 0xac7   :  { %2346 = vperm.xlu0 %3431, %v2312_v32   ;;  %2341 = vperm.xlu1 %3432, %v2311_v31   ;;  %v2368_v32 = vld [vmem:[%s4410_s14 + $0x30] sm:$0xff]  ;;  %v2369_v31 = vld [vmem:[%s4410_s14 + $0x38] sm:$0xff] }
 0xacb   :  { %2380 = vperm.xlu0 %3431, %v2370_v33   ;;  %2351 = vperm.xlu1 %3432, %v2313_v34  }
 0xacf   :  { %2390 = vperm.xlu0 %3431, %v2372_v35   ;;  %2385 = vperm.xlu1 %3432, %v2371_v37  }
 0xad3   :  { %2400 = vperm.xlu0 %3431, %v2374_v38   ;;  %2395 = vperm.xlu1 %3432, %v2373_v2  }
 0xad7   :  { %2410 = vperm.xlu0 %3431, %v2376_v39   ;;  %2405 = vperm.xlu1 %3432, %v2375_v4  }
 0xadb   :  { %2415 = vperm.xlu1 %3432, %v2377_v41  }
 0xb19   :  { %v3455_v42 = vpop.permute.xlu0 %3454 }
 0xb1a   :  { %v3457_v36 = vunpack.i.h.bf16 %v3455_v42  ;;  %v3456_v43 = vunpack.i.l.bf16 %v3455_v42 }
 0xb1c   :  { %v3329_v45 = vpack.c.bf16 %v3457_v36, %v3456_v43 }
 0xb1d   :  { %v3460_v46 = vpop.permute.xlu1 %3459 }
 0xb1e   :  { %v3462_v47 = vunpack.i.h.bf16 %v3460_v46  ;;  %v3461_v48 = vunpack.i.l.bf16 %v3460_v46  ;;  %3330 = vmatprep.subr.bf16.mxu0 %v3329_v45 }
 0xb1f   :  { %3332 = vmatpush3.bf16.msra.mxu0 %v3329_v45 }
 0xb20   :  { %v3333_v49 = vpack.c.bf16 %v3462_v47, %v3461_v48 }
 0xb21   :  { %v3465_v50 = vpop.permute.xlu0 %3464 }
 0xb22   :  { %v3467_v51 = vunpack.i.h.bf16 %v3465_v50  ;;  %v3466_v52 = vunpack.i.l.bf16 %v3465_v50  ;;  %3334 = vmatprep.subr.bf16.mxu0 %v3333_v49 }
 0xb23   :  { %3336 = vmatpush3.bf16.msra.mxu0 %v3333_v49 }
 0xb24   :  { %v3337_v40 = vpack.c.bf16 %v3467_v51, %v3466_v52 }
 0xb25   :  { %v3470_v53 = vpop.permute.xlu1 %3469  ;;  %v3475_v44 = vpop.permute.xlu0 %3474 }
 0xb26   :  { %v3472_v54 = vunpack.i.h.bf16 %v3470_v53  ;;  %v3471_v55 = vunpack.i.l.bf16 %v3470_v53  ;;  %v3477_v56 = vunpack.i.h.bf16 %v3475_v44  ;;  %v3476_v57 = vunpack.i.l.bf16 %v3475_v44  ;;  %3338 = vmatprep.subr.bf16.mxu0 %v3337_v40 }
 0xb27   :  { %3340 = vmatpush3.bf16.msra.mxu0 %v3337_v40 }
 0xb28   :  { %v3341_v58 = vpack.c.bf16 %v3472_v54, %v3471_v55  ;;  %v3345_v60 = vpack.c.bf16 %v3477_v56, %v3476_v57 }
 0xb29   :  { %v3480_v59 = vpop.permute.xlu1 %3479  ;;  %v3485_v5 = vpop.permute.xlu0 %3484 }
 0xb2a   :  { %v3482_v62 = vunpack.i.h.bf16 %v3480_v59  ;;  %v3481_v63 = vunpack.i.l.bf16 %v3480_v59  ;;  %3342 = vmatprep.subr.bf16.mxu0 %v3341_v58  ;;  %v3487_v10 = vunpack.i.h.bf16 %v3485_v5  ;;  %v3486_v11 = vunpack.i.l.bf16 %v3485_v5 }
 0xb2b   :  { %3344 = vmatpush3.bf16.msra.mxu0 %v3341_v58 }
 0xb2c   :  { %3346 = vmatprep.subr.bf16.mxu0 %v3345_v60  ;;  %v3349_v9 = vpack.c.bf16 %v3482_v62, %v3481_v63  ;;  %v3353_v15 = vpack.c.bf16 %v3487_v10, %v3486_v11 }
 0xb2d   :  { %v3490_v12 = vpop.permute.xlu1 %3489 }
 0xb2e   :  { %3150 = vmatmul.mubr.msk.f32.vlgmr.msra.gmra.mrb[20].mxu0 %vm72_vm0, %v1822_v6  ;;  %v3492_v16 = vunpack.i.h.bf16 %v3490_v12  ;;  %v3491_v17 = vunpack.i.l.bf16 %v3490_v12 }
 0xb2f   :  { %3348 = vmatpush3.bf16.msra.mxu0 %v3345_v60  ;;  %3152 = vmatprep.mubr.msk.f32.mxu0 %vm72_vm0, %v1823_v7 }
 0xb30   :  { %3350 = vmatprep.subr.bf16.mxu0 %v3349_v9  ;;  %v3357_v19 = vpack.c.bf16 %v3492_v16, %v3491_v17 }
 0xb32   :  { %3153 = vmatmul.mubr.msk.f32.gmra.mrb[22].mxu0 %vm72_vm0, %v1824_v13 }
 0xb33   :  { %3352 = vmatpush3.bf16.msra.mxu0 %v3349_v9  ;;  %3155 = vmatprep.mubr.msk.f32.mxu0 %vm72_vm0, %v1825_v14 }
 0xb34   :  { %3354 = vmatprep.subr.bf16.mxu0 %v3353_v15 }
 0xb36   :  { %3156 = vmatmul.mubr.msk.f32.gmra.mrb[24].mxu0 %vm72_vm0, %v1826_v26 }
 0xb37   :  { %3356 = vmatpush3.bf16.msra.mxu0 %v3353_v15  ;;  %3158 = vmatprep.mubr.msk.f32.mxu0 %vm72_vm0, %v1827_v18 }
 0xb38   :  { %3358 = vmatprep.subr.bf16.mxu0 %v3357_v19 }
 0xb3a   :  { %3159 = vmatmul.mubr.msk.f32.gmra.mrb[26].mxu0 %vm72_vm0, %v1828_v20  ;;  %v2317_v34 = vpop.permute.xlu0 %2316 }
 0xb3b   :  { %3360 = vmatpush3.bf16.msra.mxu0 %v3357_v19  ;;  %3177 = vmatprep.mubr.msk.f32.mxu0 %vm72_vm0, %v2679_v21 }
 0xb3c   :  { %3362 = vmatprep.subr.bf16.mxu0 %v3633_v3 }
 0xb3e   :  { %3178 = vmatmul.mubr.msk.f32.vlgmr.msra.gmra.mrb[20].mxu0 %vm72_vm0, %v2680_v27  ;;  %v2322_v33 = vpop.permute.xlu1 %2321  ;;  %v2327_v37 = vpop.permute.xlu0 %2326 }
 0xb3f   :  { %3180 = vmatprep.mubr.msk.f32.mxu0 %vm72_vm0, %v2681_v24  ;;  %3364 = vmatpush3.bf16.msra.mxu0 %v3633_v3  ;;  %v2685_v3 = vld [vmem:[%s4407_s12 + $0xb0] sm:$0xff] }
 0xb40   :  { %3366 = vmatprep.subr.bf16.mxu0 %v3649_v8 }
 0xb42   :  { %3181 = vmatmul.mubr.msk.f32.gmra.mrb[22].mxu0 %vm72_vm0, %v2682_v61  ;;  %v2332_v35 = vpop.permute.xlu1 %2331  ;;  %v2337_v2 = vpop.permute.xlu0 %2336 }
 0xb43   :  { %3183 = vmatprep.mubr.msk.f32.mxu0 %vm72_vm0, %v2683_v23  ;;  %3368 = vmatpush3.bf16.msra.mxu0 %v3649_v8  ;;  %v2363_v8 = vld [vmem:[%s4410_s14 + $0x8] sm:$0xff] }
 0xb46   :  { %3184 = vmatmul.mubr.msk.f32.gmra.mrb[24].mxu0 %vm72_vm0, %v2684_v25  ;;  %v2342_v38 = vpop.permute.xlu1 %2341  ;;  %v2347_v4 = vpop.permute.xlu0 %2346 }
 0xb47   :  { %3186 = vmatprep.mubr.msk.f32.mxu0 %vm72_vm0, %v2685_v3 }
 0xb4a   :  { %3187 = vmatmul.mubr.msk.f32.gmra.mrb[26].mxu0 %vm72_vm0, %v2686_v28  ;;  %v2352_v39 = vpop.permute.xlu1 %2351  ;;  %v2381_v42 = vpop.permute.xlu0 %2380 }
 0xb4b   :  { %3197 = vmatprep.mubr.msk.f32.mxu0 %vm170_vm1, %v2362_v1  ;;  %v3371_v46 = vadd.f32 %v2381_v42, %v2317_v34 }
 0xb4e   :  { %3198 = vmatmul.mubr.msk.f32.vlgmr.msra.gmra.mrb[20].mxu0 %vm170_vm1, %v2363_v8  ;;  %v2386_v41 = vpop.permute.xlu1 %2385  ;;  %v2391_v43 = vpop.permute.xlu0 %2390 }
 0xb4f   :  { %3200 = vmatprep.mubr.msk.f32.mxu0 %vm170_vm1, %v2364_v29  ;;  %v3369_v45 = vadd.f32 %v2386_v41, %v2322_v33  ;;  %v3375_v53 = vadd.f32 %v2391_v43, %v2327_v37 }
 0xb52   :  { %3201 = vmatmul.mubr.msk.f32.gmra.mrb[22].mxu0 %vm170_vm1, %v2365_v22  ;;  %v2396_v36 = vpop.permute.xlu1 %2395  ;;  %v2401_v40 = vpop.permute.xlu0 %2400 }
 0xb53   :  { %3203 = vmatprep.mubr.msk.f32.mxu0 %vm170_vm1, %v2366_v30  ;;  %v3373_v52 = vadd.f32 %v2396_v36, %v2332_v35  ;;  %v3379_v58 = vadd.f32 %v2401_v40, %v2337_v2 }
 0xb56   :  { %3204 = vmatmul.mubr.msk.f32.gmra.mrb[24].mxu0 %vm170_vm1, %v2367_v0  ;;  %v2406_v50 = vpop.permute.xlu1 %2405  ;;  %v2411_v62 = vpop.permute.xlu0 %2410 }
 0xb57   :  { %3206 = vmatprep.mubr.msk.f32.mxu0 %vm170_vm1, %v2368_v32  ;;  %v3377_v57 = vadd.f32 %v2406_v50, %v2342_v38  ;;  %v3383_v9 = vadd.f32 %v2411_v62, %v2347_v4 }
 0xb5a   :  { %3207 = vmatmul.mubr.msk.f32.gmra.mrb[26].mxu0 %vm170_vm1, %v2369_v31  ;;  %v2416_v59 = vpop.permute.xlu1 %2415 }
 0xb5b   :  { %v3381_v7 = vadd.f32 %v2416_v59, %v2352_v39 }
 0xc21   :  { %v3199_v47 = vpop.f32.mrb[20].mxu0 }
 0xc22   :  { %v3370_v48 = vadd.f32 %v3369_v45, %v3199_v47  ;;  %v2508_v49 = vpop.f32.mrb[21].mxu0 }
 0xc23   :  { %v3372_v51 = vadd.f32 %v3371_v46, %v2508_v49 }
 0xc24   :  { %2556 = vst.msk [vmem:[%s4411_s16 + $0x8] sm:$0xff] %vm170_vm1, %v3370_v48 }
 0xc25   :  { %2555 = vst.msk [vmem:[%s4411_s16] sm:$0xff] %vm170_vm1, %v3372_v51  ;;  %v3202_v44 = vpop.f32.mrb[22].mxu0 }
 0xc26   :  { %v3374_v54 = vadd.f32 %v3373_v52, %v3202_v44  ;;  %v2518_v55 = vpop.f32.mrb[23].mxu0 }
 0xc27   :  { %v3376_v56 = vadd.f32 %v3375_v53, %v2518_v55 }
 0xc28   :  { %2558 = vst.msk [vmem:[%s4411_s16 + $0x18] sm:$0xff] %vm170_vm1, %v3374_v54 }
 0xc29   :  { %2557 = vst.msk [vmem:[%s4411_s16 + $0x10] sm:$0xff] %vm170_vm1, %v3376_v56  ;;  %v3205_v60 = vpop.f32.mrb[24].mxu0 }
 0xc2a   :  { %v3378_v63 = vadd.f32 %v3377_v57, %v3205_v60  ;;  %v2528_v5 = vpop.f32.mrb[25].mxu0 }
 0xc2b   :  { %v3380_v6 = vadd.f32 %v3379_v58, %v2528_v5 }
 0xc2c   :  { %2560 = vst.msk [vmem:[%s4411_s16 + $0x28] sm:$0xff] %vm170_vm1, %v3378_v63 }
 0xc2d   :  { %2559 = vst.msk [vmem:[%s4411_s16 + $0x20] sm:$0xff] %vm170_vm1, %v3380_v6  ;;  %v3208_v10 = vpop.f32.mrb[26].mxu0 }
 0xc2e   :  { %v3382_v11 = vadd.f32 %v3381_v7, %v3208_v10  ;;  %v2538_v12 = vpop.f32.mrb[27].mxu0 }
 0xc2f   :  { %v3384_v13 = vadd.f32 %v3383_v9, %v2538_v12 }
 0xc30   :  { %2562 = vst.msk [vmem:[%s4411_s16 + $0x38] sm:$0xff] %vm170_vm1, %v3382_v11 }
 0xc31   :  { %2561 = vst.msk [vmem:[%s4411_s16 + $0x30] sm:$0xff] %vm170_vm1, %v3384_v13 }

</bundles_post_ra>
